<compile_context>
chip_gen: v5e
topology: v5e:2x2
jax: 0.10.0
libtpu: 0.0.40
codegen_flags: <defaults>
</compile_context>

<pallas_src>
import math
import functools

import jax
import jax.numpy as jnp
from jax.experimental import pallas as pl
from jax.experimental.pallas import tpu as pltpu


def _layernorm(x, w, b, eps=1e-5):
    mean = jnp.mean(x, axis=-1, keepdims=True)
    var = jnp.mean((x - mean) ** 2, axis=-1, keepdims=True)
    return (x - mean) * jax.lax.rsqrt(var + eps) * w + b


def self_attention_kernel(x_ref, vec_ref,
                          wq_ref, wk_ref, wv_ref, wo_ref, w1_ref, w2_ref,
                          o_ref, *, num_heads):
    BB, S, H = x_ref.shape
    hd = H // num_heads
    R = BB * S                                   # all rows of this block at once

    x = x_ref[...].reshape(R, H).astype(jnp.float32)

    # packed small params: one DMA, rows indexed statically
    vecs = vec_ref[...]                          # (10, H) f32
    ln1_w, ln1_b = vecs[0:1], vecs[1:2]
    bq, bk, bv, bo = vecs[2:3], vecs[3:4], vecs[4:5], vecs[5:6]
    ln2_w, ln2_b = vecs[6:7], vecs[7:8]
    b1, b2 = vecs[8:9], vecs[9:10]

    # --- pre-attention LayerNorm (f32 on the VPU) ---------------------------
    x_ln = _layernorm(x, ln1_w, ln1_b)
    x_ln_bf = x_ln.astype(jnp.bfloat16)

    # --- QKV projections: bf16 MXU inputs, f32 accumulation -----------------
    # (1/sqrt(hd) is already folded into wq / bq on the host.)
    q = jnp.dot(x_ln_bf, wq_ref[...], preferred_element_type=jnp.float32) + bq
    k = jnp.dot(x_ln_bf, wk_ref[...], preferred_element_type=jnp.float32) + bk
    v = jnp.dot(x_ln_bf, wv_ref[...], preferred_element_type=jnp.float32) + bv

    # --- head-batched attention: (BB*NH, S, hd) ------------------------------
    def to_heads(t):
        return (t.reshape(BB, S, num_heads, hd)
                 .transpose(0, 2, 1, 3)
                 .reshape(BB * num_heads, S, hd))

    qh = to_heads(q).astype(jnp.bfloat16)
    kh = to_heads(k).astype(jnp.bfloat16)
    vh = to_heads(v).astype(jnp.bfloat16)

    scores = jnp.einsum('bqd,bkd->bqk', qh, kh,
                        preferred_element_type=jnp.float32)      # (BB*NH, S, S)
    scores = scores - jnp.max(scores, axis=-1, keepdims=True)
    p = jnp.exp(scores)
    inv = pl.reciprocal(jnp.sum(p, axis=-1, keepdims=True), approx=True)
    p = p * inv                                                  # softmax over keys

    ctx = jnp.einsum('bqk,bkd->bqd', p.astype(jnp.bfloat16), vh,
                     preferred_element_type=jnp.float32)         # (BB*NH, S, hd)
    ctx = (ctx.reshape(BB, num_heads, S, hd)
              .transpose(0, 2, 1, 3)
              .reshape(R, H))

    # --- fused output projection (single MXU pass, K=H) + residual 1 --------
    attn = (jnp.dot(ctx.astype(jnp.bfloat16), wo_ref[...],
                    preferred_element_type=jnp.float32) + bo + x)

    # --- fc block: LayerNorm -> Linear -> GELU(exact) -> Linear -------------
    y = _layernorm(attn, ln2_w, ln2_b)
    y = jnp.dot(y.astype(jnp.bfloat16), w1_ref[...],
                preferred_element_type=jnp.float32) + b1
    y = 0.5 * y * (1.0 + jax.lax.erf(y * (1.0 / math.sqrt(2.0))))   # exact GELU
    y = jnp.dot(y.astype(jnp.bfloat16), w2_ref[...],
                preferred_element_type=jnp.float32) + b2

    o_ref[...] = (y + attn).reshape(BB, S, H).astype(o_ref.dtype)   # residual 2


def _batch_block(B):
    # v5e / v6e have a single TensorCore: the grid is a serial loop, so run the
    # whole batch in one step.  v7x has 2 TensorCores: keep a 2-way parallel
    # batch grid so the second core is used.
    try:
        kind = jax.devices()[0].device_kind.lower()
    except Exception:
        kind = ""
    if ("v7" in kind or "7x" in kind) and B % 2 == 0:
        return B // 2
    return B


def self_attention_pallas(x, p, num_heads=4):
    B, S, H = x.shape
    hd = H // num_heads
    scale = 1.0 / math.sqrt(hd)

    # Fold the attention scale into the Q projection (one-time host transform).
    wq = p["wq"] * scale
    bq = p["bq"] * scale

    # Pack the ten (1, H) vectors into a single (10, H) f32 array.
    vecs = jnp.concatenate(
        [p["ln1_w"], p["ln1_b"], bq, p["bk"], p["bv"], p["bo"],
         p["ln2_w"], p["ln2_b"], p["b1"], p["b2"]],
        axis=0).astype(jnp.float32)

    # bf16 weights for the MXU (accumulation stays f32 inside the kernel).
    weights = [wq.astype(jnp.bfloat16),
               p["wk"].astype(jnp.bfloat16),
               p["wv"].astype(jnp.bfloat16),
               p["wo"].astype(jnp.bfloat16),
               p["w1"].astype(jnp.bfloat16),
               p["w2"].astype(jnp.bfloat16)]

    bb = _batch_block(B)
    grid = (B // bb,)

    in_specs = [pl.BlockSpec((bb, S, H), lambda b: (b, 0, 0)),
                pl.BlockSpec(vecs.shape, lambda b: (0, 0))]
    for w in weights:
        in_specs.append(pl.BlockSpec(w.shape, lambda b: (0, 0)))

    kernel = functools.partial(self_attention_kernel, num_heads=num_heads)
    return pl.pallas_call(
        kernel,
        out_shape=jax.ShapeDtypeStruct((B, S, H), x.dtype),
        grid_spec=pltpu.PrefetchScalarGridSpec(
            num_scalar_prefetch=0,
            grid=grid,
            in_specs=in_specs,
            out_specs=pl.BlockSpec((bb, S, H), lambda b: (b, 0, 0)),
        ),
        compiler_params=pltpu.CompilerParams(dimension_semantics=("parallel",)),
    )(x, vecs, *weights)


# --------------------------- pure-JAX reference -----------------------------
def self_attention_ref(x, p, num_heads=4):
    def ln(t, w, b):
        m = t.mean(-1, keepdims=True)
        v = ((t - m) ** 2).mean(-1, keepdims=True)
        return (t - m) / jnp.sqrt(v + 1e-5) * w + b

    B, S, H = x.shape
    hd = H // num_heads
    x_ln = ln(x, p["ln1_w"], p["ln1_b"])
    q = x_ln @ p["wq"] + p["bq"]
    k = x_ln @ p["wk"] + p["bk"]
    v = x_ln @ p["wv"] + p["bv"]
    q = q.reshape(B, S, num_heads, hd).transpose(0, 2, 1, 3) / math.sqrt(hd)
    k = k.reshape(B, S, num_heads, hd).transpose(0, 2, 1, 3)
    v = v.reshape(B, S, num_heads, hd).transpose(0, 2, 1, 3)
    s = jnp.einsum("bhqd,bhkd->bhqk", q, k)
    pw = jax.nn.softmax(s, axis=-1)
    ctx = jnp.einsum("bhqk,bhkd->bhqd", pw, v)
    ctx = ctx.transpose(0, 2, 1, 3).reshape(B, S, H)
    attn = ctx @ p["wo"] + p["bo"] + x
    y = ln(attn, p["ln2_w"], p["ln2_b"])
    y = y @ p["w1"] + p["b1"]
    y = 0.5 * y * (1.0 + jax.lax.erf(y / math.sqrt(2.0)))
    y = y @ p["w2"] + p["b2"]
    return y + attn


def init_params(key, H):
    ks = jax.random.split(key, 8)
    n = lambda k, shape: (jax.random.normal(k, shape, jnp.float32) * 0.1)
    return {
        "ln1_w": jnp.ones((1, H), jnp.float32),
        "ln1_b": jnp.zeros((1, H), jnp.float32),
        "wq": n(ks[0], (H, H)), "bq": n(ks[1], (1, H)),
        "wk": n(ks[2], (H, H)), "bk": jnp.zeros((1, H), jnp.float32),
        "wv": n(ks[3], (H, H)), "bv": jnp.zeros((1, H), jnp.float32),
        "wo": n(ks[4], (H, H)), "bo": jnp.zeros((1, H), jnp.float32),
        "ln2_w": jnp.ones((1, H), jnp.float32),
        "ln2_b": jnp.zeros((1, H), jnp.float32),
        "w1": n(ks[5], (H, H)), "b1": n(ks[6], (1, H)),
        "w2": n(ks[7], (H, H)), "b2": jnp.zeros((1, H), jnp.float32),
    }


if __name__ == "__main__":
    B, S, H, NH = 2, 8, 32, 4
    key = jax.random.PRNGKey(0)
    kx, kp = jax.random.split(key)
    x = jax.random.normal(kx, (B, S, H), jnp.float32)
    params = init_params(kp, H)

    out = self_attention_pallas(x, params, num_heads=NH)
    out = jax.block_until_ready(out)

    ref = self_attention_ref(x, params, num_heads=NH)
    assert out.shape == (B, S, H)
    # bf16 MXU inputs (f32 accumulation) + approx reciprocal slightly change
    # numerics vs the all-f32 reference; 2e-2 leaves ample margin.
    assert jnp.allclose(out, ref, atol=2e-2, rtol=2e-2), "mismatch vs reference"
    print("KERNEL_OK")
</pallas_src>

<mosaic_0001>
module attributes {stable_mosaic.version = 11 : i64} {
  func.func @self_attention_kernel(%arg0: i32, %arg1: memref<2x8x32xf32, #tpu.memory_space<vmem>>, %arg2: memref<10x32xf32, #tpu.memory_space<vmem>>, %arg3: memref<32x32xbf16, #tpu.memory_space<vmem>>, %arg4: memref<32x32xbf16, #tpu.memory_space<vmem>>, %arg5: memref<32x32xbf16, #tpu.memory_space<vmem>>, %arg6: memref<32x32xbf16, #tpu.memory_space<vmem>>, %arg7: memref<32x32xbf16, #tpu.memory_space<vmem>>, %arg8: memref<32x32xbf16, #tpu.memory_space<vmem>>, %arg9: memref<2x8x32xf32, #tpu.memory_space<vmem>>) attributes {dimension_semantics = [#tpu.dimension_semantics<parallel>], iteration_bounds = array<i64: 1>, scalar_prefetch = 0 : i64, scratch_operands = 0 : i64, tpu.core_type = #tpu.core_type<tc>, window_params = [{transform_indices = @transform_0, window_bounds = array<i64: 2, 8, 32>}, {pipeline_mode = #tpu.pipeline_mode<synchronous>, transform_indices = @transform_1, window_bounds = array<i64: 10, 32>}, {pipeline_mode = #tpu.pipeline_mode<synchronous>, transform_indices = @transform_2, window_bounds = array<i64: 32, 32>}, {pipeline_mode = #tpu.pipeline_mode<synchronous>, transform_indices = @transform_3, window_bounds = array<i64: 32, 32>}, {pipeline_mode = #tpu.pipeline_mode<synchronous>, transform_indices = @transform_4, window_bounds = array<i64: 32, 32>}, {pipeline_mode = #tpu.pipeline_mode<synchronous>, transform_indices = @transform_5, window_bounds = array<i64: 32, 32>}, {pipeline_mode = #tpu.pipeline_mode<synchronous>, transform_indices = @transform_6, window_bounds = array<i64: 32, 32>}, {pipeline_mode = #tpu.pipeline_mode<synchronous>, transform_indices = @transform_7, window_bounds = array<i64: 32, 32>}, {transform_indices = @transform_8, window_bounds = array<i64: 2, 8, 32>}]} {
    %c0 = arith.constant 0 : index
    %c0_0 = arith.constant 0 : index
    %c0_1 = arith.constant 0 : index
    %0 = vector.load %arg1[%c0, %c0_0, %c0_1] : memref<2x8x32xf32, #tpu.memory_space<vmem>>, vector<2x8x32xf32>
    %1 = vector.shape_cast %0 : vector<2x8x32xf32> to vector<16x32xf32>
    %c0_2 = arith.constant 0 : index
    %c0_3 = arith.constant 0 : index
    %2 = vector.load %arg2[%c0_2, %c0_3] : memref<10x32xf32, #tpu.memory_space<vmem>>, vector<10x32xf32>
    %3 = vector.extract_strided_slice %2 {offsets = [0, 0], sizes = [1, 32], strides = [1, 1]} : vector<10x32xf32> to vector<1x32xf32>
    %4 = vector.extract_strided_slice %2 {offsets = [1, 0], sizes = [1, 32], strides = [1, 1]} : vector<10x32xf32> to vector<1x32xf32>
    %5 = vector.extract_strided_slice %2 {offsets = [2, 0], sizes = [1, 32], strides = [1, 1]} : vector<10x32xf32> to vector<1x32xf32>
    %6 = vector.extract_strided_slice %2 {offsets = [3, 0], sizes = [1, 32], strides = [1, 1]} : vector<10x32xf32> to vector<1x32xf32>
    %7 = vector.extract_strided_slice %2 {offsets = [4, 0], sizes = [1, 32], strides = [1, 1]} : vector<10x32xf32> to vector<1x32xf32>
    %8 = vector.extract_strided_slice %2 {offsets = [5, 0], sizes = [1, 32], strides = [1, 1]} : vector<10x32xf32> to vector<1x32xf32>
    %9 = vector.extract_strided_slice %2 {offsets = [6, 0], sizes = [1, 32], strides = [1, 1]} : vector<10x32xf32> to vector<1x32xf32>
    %10 = vector.extract_strided_slice %2 {offsets = [7, 0], sizes = [1, 32], strides = [1, 1]} : vector<10x32xf32> to vector<1x32xf32>
    %11 = vector.extract_strided_slice %2 {offsets = [8, 0], sizes = [1, 32], strides = [1, 1]} : vector<10x32xf32> to vector<1x32xf32>
    %12 = vector.extract_strided_slice %2 {offsets = [9, 0], sizes = [1, 32], strides = [1, 1]} : vector<10x32xf32> to vector<1x32xf32>
    %cst = arith.constant dense<0.000000e+00> : vector<16xf32>
    %13 = vector.multi_reduction <add>, %1, %cst [1] : vector<16x32xf32> to vector<16xf32>
    %14 = vector.shape_cast %13 : vector<16xf32> to vector<16x1xf32>
    %cst_4 = arith.constant 3.200000e+01 : f32
    %15 = vector.broadcast %cst_4 : f32 to vector<16x1xf32>
    %16 = arith.divf %14, %15 : vector<16x1xf32>
    %17 = vector.broadcast %16 : vector<16x1xf32> to vector<16x32xf32>
    %18 = arith.subf %1, %17 : vector<16x32xf32>
    %19 = arith.mulf %18, %18 : vector<16x32xf32>
    %cst_5 = arith.constant dense<0.000000e+00> : vector<16xf32>
    %20 = vector.multi_reduction <add>, %19, %cst_5 [1] : vector<16x32xf32> to vector<16xf32>
    %21 = vector.shape_cast %20 : vector<16xf32> to vector<16x1xf32>
    %cst_6 = arith.constant 3.200000e+01 : f32
    %22 = vector.broadcast %cst_6 : f32 to vector<16x1xf32>
    %23 = arith.divf %21, %22 : vector<16x1xf32>
    %24 = vector.broadcast %16 : vector<16x1xf32> to vector<16x32xf32>
    %25 = arith.subf %1, %24 : vector<16x32xf32>
    %cst_7 = arith.constant 9.99999974E-6 : f32
    %26 = vector.broadcast %cst_7 : f32 to vector<16x1xf32>
    %27 = arith.addf %23, %26 : vector<16x1xf32>
    %28 = math.rsqrt %27 : vector<16x1xf32>
    %29 = vector.broadcast %28 : vector<16x1xf32> to vector<16x32xf32>
    %30 = arith.mulf %25, %29 : vector<16x32xf32>
    %31 = vector.broadcast %3 : vector<1x32xf32> to vector<16x32xf32>
    %32 = arith.mulf %30, %31 : vector<16x32xf32>
    %33 = vector.broadcast %4 : vector<1x32xf32> to vector<16x32xf32>
    %34 = arith.addf %32, %33 : vector<16x32xf32>
    %35 = arith.truncf %34 : vector<16x32xf32> to vector<16x32xbf16>
    %c0_8 = arith.constant 0 : index
    %c0_9 = arith.constant 0 : index
    %36 = vector.load %arg3[%c0_8, %c0_9] : memref<32x32xbf16, #tpu.memory_space<vmem>>, vector<32x32xbf16>
    %cst_10 = arith.constant dense<0.000000e+00> : vector<16x32xf32>
    %37 = tpu.matmul %35, %36, %cst_10 {dimension_numbers = #tpu.dot_dimension_numbers<[1], [0], [0], [1], [0, 0, 1, 1], [], []>} : vector<16x32xbf16>, vector<32x32xbf16>, vector<16x32xf32> -> vector<16x32xf32>
    %38 = vector.broadcast %5 : vector<1x32xf32> to vector<16x32xf32>
    %39 = arith.addf %37, %38 : vector<16x32xf32>
    %c0_11 = arith.constant 0 : index
    %c0_12 = arith.constant 0 : index
    %40 = vector.load %arg4[%c0_11, %c0_12] : memref<32x32xbf16, #tpu.memory_space<vmem>>, vector<32x32xbf16>
    %cst_13 = arith.constant dense<0.000000e+00> : vector<16x32xf32>
    %41 = tpu.matmul %35, %40, %cst_13 {dimension_numbers = #tpu.dot_dimension_numbers<[1], [0], [0], [1], [0, 0, 1, 1], [], []>} : vector<16x32xbf16>, vector<32x32xbf16>, vector<16x32xf32> -> vector<16x32xf32>
    %42 = vector.broadcast %6 : vector<1x32xf32> to vector<16x32xf32>
    %43 = arith.addf %41, %42 : vector<16x32xf32>
    %c0_14 = arith.constant 0 : index
    %c0_15 = arith.constant 0 : index
    %44 = vector.load %arg5[%c0_14, %c0_15] : memref<32x32xbf16, #tpu.memory_space<vmem>>, vector<32x32xbf16>
    %cst_16 = arith.constant dense<0.000000e+00> : vector<16x32xf32>
    %45 = tpu.matmul %35, %44, %cst_16 {dimension_numbers = #tpu.dot_dimension_numbers<[1], [0], [0], [1], [0, 0, 1, 1], [], []>} : vector<16x32xbf16>, vector<32x32xbf16>, vector<16x32xf32> -> vector<16x32xf32>
    %46 = vector.broadcast %7 : vector<1x32xf32> to vector<16x32xf32>
    %47 = arith.addf %45, %46 : vector<16x32xf32>
    %48 = vector.shape_cast %39 : vector<16x32xf32> to vector<2x8x4x8xf32>
    %49 = tpu.transpose %48, [0, 2, 1, 3] : vector<2x8x4x8xf32> -> vector<2x4x8x8xf32>
    %50 = vector.shape_cast %49 : vector<2x4x8x8xf32> to vector<8x8x8xf32>
    %51 = arith.truncf %50 : vector<8x8x8xf32> to vector<8x8x8xbf16>
    %52 = vector.shape_cast %43 : vector<16x32xf32> to vector<2x8x4x8xf32>
    %53 = tpu.transpose %52, [0, 2, 1, 3] : vector<2x8x4x8xf32> -> vector<2x4x8x8xf32>
    %54 = vector.shape_cast %53 : vector<2x4x8x8xf32> to vector<8x8x8xf32>
    %55 = arith.truncf %54 : vector<8x8x8xf32> to vector<8x8x8xbf16>
    %56 = vector.shape_cast %47 : vector<16x32xf32> to vector<2x8x4x8xf32>
    %57 = tpu.transpose %56, [0, 2, 1, 3] : vector<2x8x4x8xf32> -> vector<2x4x8x8xf32>
    %58 = vector.shape_cast %57 : vector<2x4x8x8xf32> to vector<8x8x8xf32>
    %59 = arith.truncf %58 : vector<8x8x8xf32> to vector<8x8x8xbf16>
    "tpu.trace_start"() <{level = 10 : i32, message = "bqd,bkd->bqk"}> : () -> ()
    %cst_17 = arith.constant dense<0.000000e+00> : vector<8x8x8xf32>
    %60 = tpu.matmul %51, %55, %cst_17 {dimension_numbers = #tpu.dot_dimension_numbers<[2], [2], [1], [1], [0, 0, 0, 1, 1, 1], [0], [0]>} : vector<8x8x8xbf16>, vector<8x8x8xbf16>, vector<8x8x8xf32> -> vector<8x8x8xf32>
    "tpu.trace_stop"() : () -> ()
    %cst_18 = arith.constant dense<0xFF800000> : vector<8x8xf32>
    %61 = vector.multi_reduction <maximumf>, %60, %cst_18 [2] : vector<8x8x8xf32> to vector<8x8xf32>
    %62 = vector.shape_cast %61 : vector<8x8xf32> to vector<8x8x1xf32>
    %63 = vector.broadcast %62 : vector<8x8x1xf32> to vector<8x8x8xf32>
    %64 = arith.subf %60, %63 : vector<8x8x8xf32>
    %65 = math.exp %64 : vector<8x8x8xf32>
    %cst_19 = arith.constant dense<0.000000e+00> : vector<8x8xf32>
    %66 = vector.multi_reduction <add>, %65, %cst_19 [2] : vector<8x8x8xf32> to vector<8x8xf32>
    %67 = vector.shape_cast %66 : vector<8x8xf32> to vector<8x8x1xf32>
    %68 = tpu.reciprocal %67 {approx = true} : vector<8x8x1xf32> -> vector<8x8x1xf32>
    %69 = vector.broadcast %68 : vector<8x8x1xf32> to vector<8x8x8xf32>
    %70 = arith.mulf %65, %69 : vector<8x8x8xf32>
    %71 = arith.truncf %70 : vector<8x8x8xf32> to vector<8x8x8xbf16>
    "tpu.trace_start"() <{level = 10 : i32, message = "bqk,bkd->bqd"}> : () -> ()
    %cst_20 = arith.constant dense<0.000000e+00> : vector<8x8x8xf32>
    %72 = tpu.matmul %71, %59, %cst_20 {dimension_numbers = #tpu.dot_dimension_numbers<[2], [1], [1], [2], [0, 0, 0, 1, 1, 2], [0], [0]>} : vector<8x8x8xbf16>, vector<8x8x8xbf16>, vector<8x8x8xf32> -> vector<8x8x8xf32>
    "tpu.trace_stop"() : () -> ()
    %73 = vector.shape_cast %72 : vector<8x8x8xf32> to vector<2x4x8x8xf32>
    %74 = tpu.transpose %73, [0, 2, 1, 3] : vector<2x4x8x8xf32> -> vector<2x8x4x8xf32>
    %75 = vector.shape_cast %74 : vector<2x8x4x8xf32> to vector<16x32xf32>
    %76 = arith.truncf %75 : vector<16x32xf32> to vector<16x32xbf16>
    %c0_21 = arith.constant 0 : index
    %c0_22 = arith.constant 0 : index
    %77 = vector.load %arg6[%c0_21, %c0_22] : memref<32x32xbf16, #tpu.memory_space<vmem>>, vector<32x32xbf16>
    %cst_23 = arith.constant dense<0.000000e+00> : vector<16x32xf32>
    %78 = tpu.matmul %76, %77, %cst_23 {dimension_numbers = #tpu.dot_dimension_numbers<[1], [0], [0], [1], [0, 0, 1, 1], [], []>} : vector<16x32xbf16>, vector<32x32xbf16>, vector<16x32xf32> -> vector<16x32xf32>
    %79 = vector.broadcast %8 : vector<1x32xf32> to vector<16x32xf32>
    %80 = arith.addf %78, %79 : vector<16x32xf32>
    %81 = arith.addf %80, %1 : vector<16x32xf32>
    %cst_24 = arith.constant dense<0.000000e+00> : vector<16xf32>
    %82 = vector.multi_reduction <add>, %81, %cst_24 [1] : vector<16x32xf32> to vector<16xf32>
    %83 = vector.shape_cast %82 : vector<16xf32> to vector<16x1xf32>
    %cst_25 = arith.constant 3.200000e+01 : f32
    %84 = vector.broadcast %cst_25 : f32 to vector<16x1xf32>
    %85 = arith.divf %83, %84 : vector<16x1xf32>
    %86 = vector.broadcast %85 : vector<16x1xf32> to vector<16x32xf32>
    %87 = arith.subf %81, %86 : vector<16x32xf32>
    %88 = arith.mulf %87, %87 : vector<16x32xf32>
    %cst_26 = arith.constant dense<0.000000e+00> : vector<16xf32>
    %89 = vector.multi_reduction <add>, %88, %cst_26 [1] : vector<16x32xf32> to vector<16xf32>
    %90 = vector.shape_cast %89 : vector<16xf32> to vector<16x1xf32>
    %cst_27 = arith.constant 3.200000e+01 : f32
    %91 = vector.broadcast %cst_27 : f32 to vector<16x1xf32>
    %92 = arith.divf %90, %91 : vector<16x1xf32>
    %93 = vector.broadcast %85 : vector<16x1xf32> to vector<16x32xf32>
    %94 = arith.subf %81, %93 : vector<16x32xf32>
    %cst_28 = arith.constant 9.99999974E-6 : f32
    %95 = vector.broadcast %cst_28 : f32 to vector<16x1xf32>
    %96 = arith.addf %92, %95 : vector<16x1xf32>
    %97 = math.rsqrt %96 : vector<16x1xf32>
    %98 = vector.broadcast %97 : vector<16x1xf32> to vector<16x32xf32>
    %99 = arith.mulf %94, %98 : vector<16x32xf32>
    %100 = vector.broadcast %9 : vector<1x32xf32> to vector<16x32xf32>
    %101 = arith.mulf %99, %100 : vector<16x32xf32>
    %102 = vector.broadcast %10 : vector<1x32xf32> to vector<16x32xf32>
    %103 = arith.addf %101, %102 : vector<16x32xf32>
    %104 = arith.truncf %103 : vector<16x32xf32> to vector<16x32xbf16>
    %c0_29 = arith.constant 0 : index
    %c0_30 = arith.constant 0 : index
    %105 = vector.load %arg7[%c0_29, %c0_30] : memref<32x32xbf16, #tpu.memory_space<vmem>>, vector<32x32xbf16>
    %cst_31 = arith.constant dense<0.000000e+00> : vector<16x32xf32>
    %106 = tpu.matmul %104, %105, %cst_31 {dimension_numbers = #tpu.dot_dimension_numbers<[1], [0], [0], [1], [0, 0, 1, 1], [], []>} : vector<16x32xbf16>, vector<32x32xbf16>, vector<16x32xf32> -> vector<16x32xf32>
    %107 = vector.broadcast %11 : vector<1x32xf32> to vector<16x32xf32>
    %108 = arith.addf %106, %107 : vector<16x32xf32>
    %cst_32 = arith.constant 5.000000e-01 : f32
    %109 = vector.broadcast %cst_32 : f32 to vector<16x32xf32>
    %110 = arith.mulf %109, %108 : vector<16x32xf32>
    %cst_33 = arith.constant 0.707106769 : f32
    %111 = vector.broadcast %cst_33 : f32 to vector<16x32xf32>
    %112 = arith.mulf %108, %111 : vector<16x32xf32>
    %113 = math.erf %112 : vector<16x32xf32>
    %cst_34 = arith.constant 1.000000e+00 : f32
    %114 = vector.broadcast %cst_34 : f32 to vector<16x32xf32>
    %115 = arith.addf %114, %113 : vector<16x32xf32>
    %116 = arith.mulf %110, %115 : vector<16x32xf32>
    %117 = arith.truncf %116 : vector<16x32xf32> to vector<16x32xbf16>
    %c0_35 = arith.constant 0 : index
    %c0_36 = arith.constant 0 : index
    %118 = vector.load %arg8[%c0_35, %c0_36] : memref<32x32xbf16, #tpu.memory_space<vmem>>, vector<32x32xbf16>
    %cst_37 = arith.constant dense<0.000000e+00> : vector<16x32xf32>
    %119 = tpu.matmul %117, %118, %cst_37 {dimension_numbers = #tpu.dot_dimension_numbers<[1], [0], [0], [1], [0, 0, 1, 1], [], []>} : vector<16x32xbf16>, vector<32x32xbf16>, vector<16x32xf32> -> vector<16x32xf32>
    %120 = vector.broadcast %12 : vector<1x32xf32> to vector<16x32xf32>
    %121 = arith.addf %119, %120 : vector<16x32xf32>
    %122 = arith.addf %121, %81 : vector<16x32xf32>
    %123 = vector.shape_cast %122 : vector<16x32xf32> to vector<2x8x32xf32>
    %c0_38 = arith.constant 0 : index
    %c0_39 = arith.constant 0 : index
    %c0_40 = arith.constant 0 : index
    %124 = vector.load %arg9[%c0_38, %c0_39, %c0_40] : memref<2x8x32xf32, #tpu.memory_space<vmem>>, vector<2x8x32xf32>
    tpu.vector_store %arg9[%c0_38, %c0_39, %c0_40], %123 {strides = array<i32>} : memref<2x8x32xf32, #tpu.memory_space<vmem>>, vector<2x8x32xf32>,
    return
  }
  func.func @transform_0(%arg0: i32) -> (i32, i32, i32) {
    %c0_i32 = arith.constant 0 : i32
    %c0_i32_0 = arith.constant 0 : i32
    %c0_i32_1 = arith.constant 0 : i32
    return %arg0, %c0_i32, %c0_i32_0 : i32, i32, i32
  }
  func.func @transform_1(%arg0: i32) -> (i32, i32) {
    %c0_i32 = arith.constant 0 : i32
    %c0_i32_0 = arith.constant 0 : i32
    %c0_i32_1 = arith.constant 0 : i32
    return %c0_i32, %c0_i32_0 : i32, i32
  }
  func.func @transform_2(%arg0: i32) -> (i32, i32) {
    %c0_i32 = arith.constant 0 : i32
    %c0_i32_0 = arith.constant 0 : i32
    %c0_i32_1 = arith.constant 0 : i32
    return %c0_i32, %c0_i32_0 : i32, i32
  }
  func.func @transform_3(%arg0: i32) -> (i32, i32) {
    %c0_i32 = arith.constant 0 : i32
    %c0_i32_0 = arith.constant 0 : i32
    %c0_i32_1 = arith.constant 0 : i32
    return %c0_i32, %c0_i32_0 : i32, i32
  }
  func.func @transform_4(%arg0: i32) -> (i32, i32) {
    %c0_i32 = arith.constant 0 : i32
    %c0_i32_0 = arith.constant 0 : i32
    %c0_i32_1 = arith.constant 0 : i32
    return %c0_i32, %c0_i32_0 : i32, i32
  }
  func.func @transform_5(%arg0: i32) -> (i32, i32) {
    %c0_i32 = arith.constant 0 : i32
    %c0_i32_0 = arith.constant 0 : i32
    %c0_i32_1 = arith.constant 0 : i32
    return %c0_i32, %c0_i32_0 : i32, i32
  }
  func.func @transform_6(%arg0: i32) -> (i32, i32) {
    %c0_i32 = arith.constant 0 : i32
    %c0_i32_0 = arith.constant 0 : i32
    %c0_i32_1 = arith.constant 0 : i32
    return %c0_i32, %c0_i32_0 : i32, i32
  }
  func.func @transform_7(%arg0: i32) -> (i32, i32) {
    %c0_i32 = arith.constant 0 : i32
    %c0_i32_0 = arith.constant 0 : i32
    %c0_i32_1 = arith.constant 0 : i32
    return %c0_i32, %c0_i32_0 : i32, i32
  }
  func.func @transform_8(%arg0: i32) -> (i32, i32, i32) {
    %c0_i32 = arith.constant 0 : i32
    %c0_i32_0 = arith.constant 0 : i32
    %c0_i32_1 = arith.constant 0 : i32
    return %arg0, %c0_i32, %c0_i32_0 : i32, i32, i32
  }
}

</mosaic_0001>

<bundles_post_ra>
// kernel: tpu_custom_call.1
= control target key start
LH: loop header
LB: loop body
LE: loop exit
PB: predicated region body
PF: predicated region fallthrough
CT: control target
= control target key end

     0   :  { %13 = vsyncpa [#allocation3], 0  ;;  %s3130_s0 = inlined_call_operand.hbm [shape: f32[2,8,32], index: 0, kind: input, shape index: {}]   ;;  %s3131_s1 = inlined_call_operand.hbm [shape: f32[10,32], index: 1, kind: input, shape index: {}]   ;;  %s3132_s2 = inlined_call_operand.hbm [shape: bf16[32,32], index: 2, kind: input, shape index: {}]   ;;  %s3133_s3 = inlined_call_operand.hbm [shape: bf16[32,32], index: 3, kind: input, shape index: {}]   ;;  %s3134_s4 = inlined_call_operand.hbm [shape: bf16[32,32], index: 4, kind: input, shape index: {}]   ;;  %s3135_s5 = inlined_call_operand.hbm [shape: bf16[32,32], index: 5, kind: input, shape index: {}]   ;;  %s3136_s6 = inlined_call_operand.hbm [shape: bf16[32,32], index: 6, kind: input, shape index: {}]   ;;  %s3137_s7 = inlined_call_operand.hbm [shape: bf16[32,32], index: 7, kind: input, shape index: {}]   ;;  %s3138_s8 = inlined_call_operand.hbm [shape: f32[2,8,32], index: 8, kind: output, shape index: {}]  }
   0x1   :  { %14 = vsyncpa [#allocation6], 0 }
   0x2   :  { %15 = vsyncpa [#allocation9], 0 }
   0x3   :  { %16 = vsyncpa [#allocation12], 0 }
   0x4   :  { %17 = vsyncpa [#allocation15], 0 }
   0x5   :  { %18 = vsyncpa [#allocation4], 0  ;;  %s36_s29 = sshll.u32 %s3131_s1, 4  ;;  %s2403_s30 = smov [#allocation5]   ;;  %s37_s29 = int_to_ptr.hbm [resolvable:$true] %s36_s29 }
   0x6   :  { %s38_s9 = sshll.u32 %s2403_s30, 4  ;;  %s2404_s10 = smov 128   ;;  %s39_s9 = int_to_ptr.vmem [resolvable:$true] %s38_s9 }
   0x7   :  { %s2405_s11 = smov 8   ;;  %s62_s14 = sshll.u32 %s3133_s3, 4  ;;  %s63_s14 = int_to_ptr.hbm [resolvable:$true] %s62_s14 }
   0x8   :  { %44 = dma.hbm_to_vmem [thread:$0]  %s37_s29, 256, %s39_s9, [#allocation6], %s2404_s10, %s2404_s10, %s2405_s11  }
   0x9   :  { %s2406_s15 = smov [#allocation8]   ;;  %s88_s1 = sshll.u32 %s3135_s5, 4  ;;  %s89_s1 = int_to_ptr.hbm [resolvable:$true] %s88_s1 }
   0xa   :  { %s64_s16 = sshll.u32 %s2406_s15, 4  ;;  %s2407_s19 = smov 64   ;;  %s65_s16 = int_to_ptr.vmem [resolvable:$true] %s64_s16 }
   0xb   :  { %s2408_s20 = smov 4   ;;  %s23_s23 = sshll.u32 %s3130_s0, 4  ;;  %s24_s23 = int_to_ptr.hbm [resolvable:$true] %s23_s23 }
   0xc   :  { %70 = dma.hbm_to_vmem [thread:$0]  %s63_s14, 256, %s65_s16, [#allocation9], %s2407_s19, %s2407_s19, %s2408_s20  }
   0xd   :  { %s2409_s3 = smov [#allocation11]   ;;  %s2410_s5 = smov [#allocation2]  }
   0xe   :  { %s90_s24 = sshll.u32 %s2409_s3, 4  ;;  %s25_s25 = sshll.u32 %s2410_s5, 4  ;;  %s91_s24 = int_to_ptr.vmem [resolvable:$true] %s90_s24  ;;  %s26_s25 = int_to_ptr.vmem [resolvable:$true] %s25_s25 }
   0xf   :  { %96 = dma.hbm_to_vmem [thread:$0]  %s89_s1, 256, %s91_s24, [#allocation12], %s2407_s19, %s2407_s19, %s2408_s20  }
  0x10   :  { %s49_s28 = sshll.u32 %s3132_s2, 4  ;;  %s75_s30 = sshll.u32 %s3134_s4, 4  ;;  %s50_s28 = int_to_ptr.hbm [resolvable:$true] %s49_s28  ;;  %s76_s30 = int_to_ptr.hbm [resolvable:$true] %s75_s30 }
  0x11   :  { %31 = dma.hbm_to_vmem [thread:$0]  %s24_s23, 256, %s26_s25, [#allocation3], %s2404_s10, %s2404_s10, %s2405_s11  }
  0x12   :  { %s2411_s9 = smov [#allocation7]   ;;  %s2412_s13 = smov [#allocation10]  }
  0x13   :  { %s51_s12 = sshll.u32 %s2411_s9, 4  ;;  %s77_s2 = sshll.u32 %s2412_s13, 4  ;;  %s52_s12 = int_to_ptr.vmem [resolvable:$true] %s51_s12  ;;  %s78_s2 = int_to_ptr.vmem [resolvable:$true] %s77_s2 }
  0x14   :  { %57 = dma.hbm_to_vmem [thread:$0]  %s50_s28, 256, %s52_s12, [#allocation6], %s2407_s19, %s2407_s19, %s2408_s20  }
  0x15   :  { %s101_s16 = sshll.u32 %s3136_s6, 4  ;;  %s114_s18 = sshll.u32 %s3137_s7, 4  ;;  %s102_s16 = int_to_ptr.hbm [resolvable:$true] %s101_s16  ;;  %s115_s18 = int_to_ptr.hbm [resolvable:$true] %s114_s18 }
  0x16   :  { %83 = dma.hbm_to_vmem [thread:$0]  %s76_s30, 256, %s78_s2, [#allocation9], %s2407_s19, %s2407_s19, %s2408_s20  }
  0x17   :  { %s2413_s1 = smov [#allocation13]   ;;  %s2414_s22 = smov [#allocation14]  }
  0x18   :  { %s103_s21 = sshll.u32 %s2413_s1, 4  ;;  %s116_s6 = sshll.u32 %s2414_s22, 4  ;;  %s104_s21 = int_to_ptr.vmem [resolvable:$true] %s103_s21  ;;  %s117_s6 = int_to_ptr.vmem [resolvable:$true] %s116_s6 }
  0x19   :  { %109 = dma.hbm_to_vmem [thread:$0]  %s102_s16, 256, %s104_s21, [#allocation12], %s2407_s19, %s2407_s19, %s2408_s20  }
  0x1a   :  { %122 = dma.hbm_to_vmem [thread:$0]  %s115_s18, 256, %s117_s6, [#allocation15], %s2407_s19, %s2407_s19, %s2408_s20  }
  0x1b   :  { %2391 = dma.done.wait [#allocation3], 256  }
  0x1c   :  { %2392 = vsyncadd [#allocation3], 4294967040 }
  0x1d   :  { %2393 = dma.done.wait [#allocation6], 512  }
  0x1e   :  { %2394 = vsyncadd [#allocation6], 4294966784 }
  0x1f   :  { %2395 = dma.done.wait [#allocation9], 512  }
  0x20   :  { %2396 = vsyncadd [#allocation9], 4294966784 }
  0x21   :  { %2397 = dma.done.wait [#allocation12], 512  }
  0x22   :  { %2398 = vsyncadd [#allocation12], 4294966784 }
  0x23   :  { %2399 = dma.done.wait [#allocation15], 256  }
  0x24   :  { %2400 = vsyncadd [#allocation15], 4294967040  ;;  %vm160_vm0 = vcmask 261120   ;;  %v156_v0 = vld [vmem:[#allocation2] sm:$0xff]  ;;  %v157_v2 = vld [vmem:[#allocation2 + $0x8] sm:$0xff]  ;;  %v2415_v4 = vmov 32.0  }
  0x25   :  { %v161_v1 = vsel %vm160_vm0, %v156_v0, 0.0  ;;  %v164_v3 = vsel %vm160_vm0, %v157_v2, 0.0  ;;  %2126 = vrcp.f32 %v2415_v4  ;;  %v2059_v21 = vld [vmem:[#allocation7 + $0x8] sm:$0xff]  ;;  %v2061_v22 = vld [vmem:[#allocation8 + $0x8] sm:$0xff]  ;;  %v2058_v25 = vld [vmem:[#allocation7] sm:$0xff]  ;;  %s2416_s7 = smov 104  }
  0x26   :  { %162 = vadd.xlane.f32.xlu0 %v161_v1  ;;  %v2063_v23 = vld [vmem:[#allocation10 + $0x8] sm:$0xff]  ;;  %245 = vmatpush.bf16.msra.mxu0 %v2059_v21  ;;  %v2060_v26 = vld [vmem:[#allocation8] sm:$0xff]  ;;  %v2062_v28 = vld [vmem:[#allocation10] sm:$0xff]  ;;  %s2417_s19 = smov 112   ;;  %s2418_s20 = smov 120   ;;  %vm336_vm8 = vcmask 1047556  }
  0x27   :  { %276 = vmatpush.bf16.msra.mxu1 %v2061_v22  ;;  %307 = vmatpush.bf16.msra.mxu2 %v2063_v23  ;;  %v2527_v44 = vld [vmem:[#allocation5] sm:$0xff]  ;;  %vm1060_vm9 = vcmask 64512   ;;  %vm1312_vm10 = vcmask 1043456   ;;  %s2421_s23 = smov 24   ;;  %s2422_s3 = smov 16   ;;  %vm1708_vm11 = vcmask 130048  }
  0x28   :  { %v212_v47 = vperm.slane %v2527_v44, 0  ;;  %v215_v52 = vperm.slane %v2527_v44, 1  ;;  %v223_v57 = vperm.slane %v2527_v44, 2  ;;  %v257_v58 = vperm.slane %v2527_v44, 3  ;;  %s2423_s24 = smov [#allocation16]   ;;  %s1969_s27 = sshll.u32 %s3138_s8, 4  ;;  %s1970_s27 = int_to_ptr.hbm [resolvable:$true] %s1969_s27 }
  0x29   :  { %vm1711_vm12 = vcmask 195584   ;;  %s1967_s5 = sshll.u32 %s2423_s24, 4  ;;  %s1968_s5 = int_to_ptr.vmem [resolvable:$true] %s1967_s5 }
  0x2a   :  { %246 = vmatpush.bf16.msra.mxu0 %v2058_v25 }
  0x2b   :  { %v2127_v5 = vpop.eup %2126  ;;  %277 = vmatpush.bf16.msra.mxu1 %v2060_v26  ;;  %308 = vmatpush.bf16.msra.mxu2 %v2062_v28 }
  0x2c   :  { %v168_v6 = vmul.f32 32.0, %v2127_v5  ;;  %vm172_vm1 = vweird.f32 %v2127_v5 }
  0x2e   :  { %165 = vadd.xlane.f32.xlu0 %v164_v3  ;;  %v169_v7 = vsub.f32 1.0, %v168_v6 }
  0x30   :  { %v170_v8 = vmul.f32 %v2127_v5, %v169_v7  ;;  %v2419_v7 = vmov 1983009808  }
  0x32   :  { %v171_v9 = vadd.f32 %v2127_v5, %v170_v8  ;;  %v341_v8 = vunpack.c.l.s4 %v2419_v7 }
  0x34   :  { %v2519_v10 = vsel %vm172_vm1, %v2127_v5, %v171_v9 }
  0x99   :  { %v163_v11 = vpop.xlane.xlu0 %162 }
  0x9a   :  { %v174_v12 = vmul.f32 %v2519_v10, %v163_v11 }
  0x9c   :  { %v176_v13 = vsub.f32 %v156_v0, %v174_v12 }
  0x9e   :  { %v178_v14 = vmul.f32 %v176_v13, %v176_v13 }
  0xa0   :  { %v180_v15 = vsel %vm160_vm0, %v178_v14, 0.0 }
  0xa1   :  { %181 = vadd.xlane.f32.xlu1 %v180_v15  ;;  %v166_v16 = vpop.xlane.xlu0 %165 }
  0xa2   :  { %v175_v17 = vmul.f32 %v2519_v10, %v166_v16 }
  0xa4   :  { %v177_v18 = vsub.f32 %v157_v2, %v175_v17 }
  0xa6   :  { %v179_v19 = vmul.f32 %v177_v18, %v177_v18 }
  0xa8   :  { %v183_v20 = vsel %vm160_vm0, %v179_v19, 0.0 }
  0xa9   :  { %184 = vadd.xlane.f32.xlu1 %v183_v20  ;;  %v2420_v20 = vmov 1934713408  }
  0xaa   :  { %v365_v21 = vunpack.c.l.s4 %v2420_v20 }
 0x114   :  { %v182_v24 = vpop.xlane.xlu1 %181 }
 0x115   :  { %v186_v27 = vmul.f32 %v182_v24, %v2519_v10 }
 0x117   :  { %v188_v29 = vadd.f32 1e-05, %v186_v27 }
 0x119   :  { %2128 = vrsqrt.f32 %v188_v29  ;;  %vm196_vm3 = vweird.f32 %v188_v29 }
 0x11c   :  { %v185_v30 = vpop.xlane.xlu1 %184 }
 0x11d   :  { %v187_v31 = vmul.f32 %v185_v30, %v2519_v10 }
 0x11f   :  { %v2129_v32 = vpop.eup %2128  ;;  %v189_v33 = vadd.f32 1e-05, %v187_v31 }
 0x120   :  { %v191_v34 = vmul.f32 %v2129_v32, %v188_v29  ;;  %vm197_vm2 = vweird.f32 %v2129_v32  ;;  %v2573_v29 = vunpack.c.0.s8 %v365_v21 }
 0x121   :  { %2130 = vrsqrt.f32 %v189_v33  ;;  %vm198_vm4 = vmor %vm196_vm3, %vm197_vm2  ;;  %vm206_vm6 = vweird.f32 %v189_v33 }
 0x122   :  { %v192_v35 = vmul.f32 %v2129_v32, %v191_v34 }
 0x124   :  { %v193_v36 = vmul.f32 0.5, %v192_v35 }
 0x126   :  { %v194_v37 = vsub.f32 1.5, %v193_v36 }
 0x127   :  { %v2131_v38 = vpop.eup %2130 }
 0x128   :  { %v195_v39 = vmul.f32 %v2129_v32, %v194_v37  ;;  %v201_v40 = vmul.f32 %v2131_v38, %v189_v33  ;;  %vm207_vm5 = vweird.f32 %v2131_v38 }
 0x129   :  { %vm208_vm7 = vmor %vm206_vm6, %vm207_vm5 }
 0x12a   :  { %v202_v41 = vmul.f32 %v2131_v38, %v201_v40  ;;  %v199_v42 = vsel %vm198_vm4, %v2129_v32, %v195_v39 }
 0x12b   :  { %v210_v46 = vmul.f32 %v199_v42, %v176_v13  ;;  %v2562_v13 = vunpack.c.0.s8 %v341_v8 }
 0x12c   :  { %v203_v43 = vmul.f32 0.5, %v202_v41 }
 0x12d   :  { %v213_v51 = vmul.f32 %v212_v47, %v210_v46 }
 0x12e   :  { %v204_v45 = vsub.f32 1.5, %v203_v43 }
 0x12f   :  { %v216_v54 = vadd.f32 %v215_v52, %v213_v51 }
 0x130   :  { %v205_v48 = vmul.f32 %v2131_v38, %v204_v45 }
 0x132   :  { %v209_v49 = vsel %vm208_vm7, %v2131_v38, %v205_v48 }
 0x133   :  { %v211_v50 = vmul.f32 %v209_v49, %v177_v18 }
 0x135   :  { %v214_v53 = vmul.f32 %v212_v47, %v211_v50 }
 0x137   :  { %v217_v55 = vadd.f32 %v215_v52, %v214_v53 }
 0x139   :  { %v218_v56 = vpack.c.bf16 %v217_v55, %v216_v54 }
 0x13b   :  { %1994 = vmatmul.msk.bf16.vlgmr.msra.gmra.mxu0 %vm160_vm0, %v218_v56  ;;  %2003 = vmatmul.msk.bf16.vlgmr.msra.gmra.mxu1 %vm160_vm0, %v218_v56 }
 0x13c   :  { %2012 = vmatmul.msk.bf16.vlgmr.msra.gmra.mxu2 %vm160_vm0, %v218_v56 }
 0x1b8   :  { %v248_v59 = vpop.f32.mrf.mxu0  ;;  %v279_v60 = vpop.f32.mrf.mxu1 }
 0x1b9   :  { %v2536_v61 = vadd.f32 %v248_v59, %v223_v57  ;;  %v280_v62 = vadd.f32 %v279_v60, %v257_v58 }
 0x1bb   :  { %578 = vrot.lane.b32.xlu0 %v280_v62, %s2416_s7  ;;  %323 = vrot.lane.b32.xlu1 %v2536_v61, %s2417_s19  ;;  %v2091_v63 = vpack.i.bf16 %v2536_v61, %v280_v62  ;;  %v586_v11 = vrot.slane %v280_v62, 4  ;;  %v338_v28 = vrot.slane %v2536_v61, 4 }
 0x1bd   :  { %2092 = vrot.lane.b32.xlu2 %v2091_v63, %s2418_s20 }
 0x1c0   :  { %v250_v0 = vpop.f32.mrf.mxu0  ;;  %v281_v1 = vpop.f32.mrf.mxu1 }
 0x1c1   :  { %v2543_v2 = vadd.f32 %v250_v0, %v223_v57  ;;  %v2545_v3 = vadd.f32 %v281_v1, %v257_v58 }
 0x1c3   :  { %580 = vrot.lane.b32.xlu0 %v2545_v3, %s2416_s7  ;;  %325 = vrot.lane.b32.xlu1 %v2543_v2, %s2417_s19  ;;  %v394_v32 = vrot.slane %v2543_v2, 4  ;;  %v642_v33 = vrot.slane %v2545_v3, 4 }
 0x1c5   :  { %572 = vrot.lane.b32.xlu2 %v280_v62, %s2417_s19 }
 0x1cb   :  { %331 = vrot.lane.b32.xlu0 %v2543_v2, %s2416_s7 }
 0x1cd   :  { %329 = vrot.lane.b32.xlu2 %v2536_v61, %s2416_s7 }
 0x1d5   :  { %568 = vrot.lane.b32.xlu2 %v2545_v3, %s2418_s20 }
 0x1dd   :  { %574 = vrot.lane.b32.xlu2 %v2545_v3, %s2417_s19 }
 0x1e5   :  { %319 = vrot.lane.b32.xlu2 %v2543_v2, %s2418_s20 }
 0x217   :  { %v2093_v4 = vpop.permute.xlu2 %2092 }
 0x218   :  { %v2095_v6 = vunpack.i.h.bf16 %v2093_v4  ;;  %v2094_v15 = vunpack.i.l.bf16 %v2093_v4 }
 0x21a   :  { %v350_v12 = vrot.slane %v2095_v6, 4  ;;  %v598_v25 = vrot.slane %v2094_v15, 4 }
 0x21f   :  { %v573_v5 = vpop.permute.xlu2 %572 }
 0x220   :  { %v584_v9 = vrot.slane %v573_v5, 4  ;;  %v587_v17 = vsel %vm336_vm8, %v573_v5, %v586_v11 }
 0x221   :  { %v595_v24 = vperm.slane %v587_v17, %v2562_v13 }
 0x222   :  { %v585_v16 = vsel %vm336_vm8, %v584_v9, %v280_v62 }
 0x223   :  { %v591_v23 = vperm.slane %v585_v16, %v2562_v13  ;;  %v622_v39 = vrot.slane %v595_v24, 4 }
 0x225   :  { %v610_v38 = vrot.slane %v591_v23, 4 }
 0x227   :  { %v330_v14 = vpop.permute.xlu2 %329 }
 0x228   :  { %v348_v18 = vrot.slane %v330_v14, 4  ;;  %v351_v19 = vsel %vm336_vm8, %v330_v14, %v350_v12 }
 0x229   :  { %v359_v27 = vperm.slane %v351_v19, %v2562_v13 }
 0x22a   :  { %v349_v22 = vsel %vm336_vm8, %v348_v18, %v2095_v6 }
 0x22b   :  { %v355_v26 = vperm.slane %v349_v22, %v2562_v13  ;;  %v372_v45 = vrot.slane %v359_v27, 4 }
 0x22d   :  { %v579_v30 = vpop.permute.xlu0 %578  ;;  %v324_v31 = vpop.permute.xlu1 %323  ;;  %v360_v43 = vrot.slane %v355_v26, 4 }
 0x22e   :  { %v596_v34 = vrot.slane %v579_v30, 4  ;;  %v599_v35 = vsel %vm336_vm8, %v579_v30, %v598_v25  ;;  %v335_v36 = vrot.slane %v324_v31, 4  ;;  %v339_v37 = vsel %vm336_vm8, %v324_v31, %v338_v28 }
 0x22f   :  { %v607_v40 = vperm.slane %v599_v35, %v2562_v13  ;;  %v347_v41 = vperm.slane %v339_v37, %v2562_v13  ;;  %v569_v42 = vpop.permute.xlu2 %568 }
 0x230   :  { %v597_v46 = vsel %vm336_vm8, %v596_v34, %v2094_v15  ;;  %v337_v47 = vsel %vm336_vm8, %v335_v36, %v2536_v61  ;;  %v654_v55 = vrot.slane %v569_v42, 4 }
 0x231   :  { %v603_v48 = vperm.slane %v597_v46, %v2562_v13  ;;  %v620_v49 = vrot.slane %v607_v40, 4  ;;  %v623_v50 = vsel %vm336_vm8, %v607_v40, %v622_v39  ;;  %v343_v51 = vperm.slane %v337_v47, %v2562_v13 }
 0x232   :  { %v631_v52 = vperm.slane %v623_v50, %v2573_v29  ;;  %v373_v53 = vsel %vm336_vm8, %v372_v45, %v347_v41  ;;  %v374_v54 = vrot.slane %v347_v41, 4 }
 0x233   :  { %v608_v56 = vrot.slane %v603_v48, 4  ;;  %v611_v57 = vsel %vm336_vm8, %v603_v48, %v610_v38  ;;  %v621_v58 = vsel %vm336_vm8, %v620_v49, %v595_v24  ;;  %v361_v59 = vsel %vm336_vm8, %v360_v43, %v343_v51 }
 0x234   :  { %v619_v60 = vperm.slane %v611_v57, %v2573_v29  ;;  %v627_v61 = vperm.slane %v621_v58, %v2573_v29  ;;  %v638_v62 = vrot.slane %v631_v52, 4  ;;  %v362_v63 = vrot.slane %v343_v51, 4 }
 0x235   :  { %v609_v0 = vsel %vm336_vm8, %v608_v56, %v591_v23  ;;  %v367_v1 = vperm.slane %v361_v59, %v2573_v29  ;;  %v375_v4 = vsel %vm336_vm8, %v359_v27, %v374_v54  ;;  %v379_v5 = vperm.slane %v373_v53, %v2573_v29  ;;  %v581_v6 = vpop.permute.xlu0 %580  ;;  %v326_v22 = vpop.permute.xlu1 %325 }
 0x236   :  { %v615_v7 = vperm.slane %v609_v0, %v2573_v29  ;;  %v634_v8 = vrot.slane %v619_v60, 4  ;;  %v636_v9 = vrot.slane %v627_v61, 4  ;;  %v639_v11 = vsel %vm336_vm8, 0.0, %v638_v62 }
 0x237   :  { %v707_v12 = vsel %vm336_vm8, %v638_v62, %v627_v61  ;;  %v712_v14 = vrot.slane %v639_v11, 4  ;;  %v363_v15 = vsel %vm336_vm8, %v355_v26, %v362_v63  ;;  %v383_v16 = vperm.slane %v375_v4, %v2573_v29  ;;  %v575_v17 = vpop.permute.xlu2 %574 }
 0x238   :  { %v632_v18 = vrot.slane %v615_v7, 4  ;;  %v635_v19 = vsel %vm336_vm8, 0.0, %v634_v8  ;;  %v637_v20 = vsel %vm336_vm8, 0.0, %v636_v9  ;;  %v2606_v21 = vperm.slane %v707_v12, %v2562_v13 }
 0x239   :  { %v701_v23 = vrot.slane %v635_v19, 4  ;;  %v2609_v24 = vsel %vm336_vm8, %v712_v14, %v637_v20  ;;  %v371_v25 = vperm.slane %v363_v15, %v2573_v29  ;;  %v384_v27 = vrot.slane %v367_v1, 4 }
 0x23a   :  { %v388_v26 = vrot.slane %v379_v5, 4  ;;  %v390_v28 = vrot.slane %v383_v16, 4  ;;  %v652_v30 = vrot.slane %v581_v6, 4  ;;  %v655_v31 = vsel %vm336_vm8, %v581_v6, %v654_v55 }
 0x23b   :  { %v2614_v34 = vsel %vm336_vm8, 0.0, %v384_v27  ;;  %v386_v35 = vrot.slane %v371_v25, 4  ;;  %v663_v36 = vperm.slane %v655_v31, %v2562_v13  ;;  %v392_v37 = vrot.slane %v326_v22, 4 }
 0x23c   :  { %v389_v38 = vsel %vm336_vm8, 0.0, %v388_v26  ;;  %v391_v39 = vsel %vm336_vm8, 0.0, %v390_v28  ;;  %v459_v40 = vsel %vm336_vm8, %v390_v28, %v379_v5  ;;  %v653_v41 = vsel %vm336_vm8, %v652_v30, %v569_v42 }
 0x23d   :  { %v2622_v43 = vsel %vm336_vm8, 0.0, %v386_v35  ;;  %v448_v45 = vsel %vm336_vm8, %v386_v35, %v367_v1  ;;  %v2626_v46 = vperm.slane %v459_v40, %v2562_v13  ;;  %v464_v47 = vrot.slane %v391_v39, 4  ;;  %v332_v52 = vpop.permute.xlu0 %331 }
 0x23e   :  { %v2629_v48 = vperm.slane %v448_v45, %v2562_v13  ;;  %v453_v49 = vrot.slane %v2622_v43, 4  ;;  %v659_v50 = vperm.slane %v653_v41, %v2562_v13  ;;  %v676_v51 = vrot.slane %v663_v36, 4 }
 0x23f   :  { %v465_v42 = vsel %vm336_vm8, %v464_v47, %v389_v38  ;;  %v484_v53 = vrot.slane %v2626_v46, 4  ;;  %v393_v54 = vsel %vm336_vm8, %v392_v37, %v2543_v2  ;;  %v395_v55 = vsel %vm336_vm8, %v326_v22, %v394_v32  ;;  %v320_v56 = vpop.permute.xlu2 %319 }
 0x240   :  { %v2641_v57 = vperm.slane %v465_v42, %v2562_v13  ;;  %v664_v58 = vrot.slane %v659_v50, 4  ;;  %v399_v59 = vperm.slane %v393_v54, %v2562_v13  ;;  %v403_v60 = vperm.slane %v395_v55, %v2562_v13 }
 0x241   :  { %v640_v61 = vrot.slane %v575_v17, 4  ;;  %v643_v62 = vsel %vm336_vm8, %v575_v17, %v642_v33  ;;  %v404_v63 = vrot.slane %v332_v52, 4  ;;  %v406_v0 = vrot.slane %v320_v56, 4 }
 0x242   :  { %v418_v1 = vrot.slane %v399_v59, 4  ;;  %v430_v2 = vrot.slane %v403_v60, 4  ;;  %v651_v32 = vperm.slane %v643_v62, %v2562_v13  ;;  %v633_v4 = vsel %vm336_vm8, 0.0, %v632_v18 }
 0x243   :  { %v641_v5 = vsel %vm336_vm8, %v640_v61, %v2545_v3  ;;  %v405_v6 = vsel %vm336_vm8, %v404_v63, %v320_v56  ;;  %v407_v9 = vsel %vm336_vm8, %v332_v52, %v406_v0  ;;  %v696_v11 = vsel %vm336_vm8, %v634_v8, %v615_v7 }
 0x244   :  { %v647_v12 = vperm.slane %v641_v5, %v2562_v13  ;;  %v677_v33 = vsel %vm336_vm8, %v676_v51, %v651_v32  ;;  %v678_v14 = vrot.slane %v651_v32, 4  ;;  %v411_v15 = vperm.slane %v405_v6, %v2562_v13 }
 0x245   :  { %v683_v16 = vperm.slane %v677_v33, %v2573_v29  ;;  %v415_v17 = vperm.slane %v407_v9, %v2562_v13  ;;  %v2661_v18 = vperm.slane %v696_v11, %v2562_v13  ;;  %v702_v3 = vsel %vm336_vm8, %v701_v23, %v633_v4 }
 0x246   :  { %v665_v19 = vsel %vm336_vm8, %v664_v58, %v647_v12  ;;  %v666_v20 = vrot.slane %v647_v12, 4  ;;  %v679_v7 = vsel %vm336_vm8, %v663_v36, %v678_v14  ;;  %v416_v8 = vrot.slane %v411_v15, 4 }
 0x247   :  { %v671_v22 = vperm.slane %v665_v19, %v2573_v29  ;;  %v687_v25 = vperm.slane %v679_v7, %v2573_v29  ;;  %v692_v27 = vrot.slane %v683_v16, 4  ;;  %v419_v26 = vsel %vm336_vm8, %v411_v15, %v418_v1 }
 0x248   :  { %v667_v28 = vsel %vm336_vm8, %v659_v50, %v666_v20  ;;  %v417_v30 = vsel %vm336_vm8, %v416_v8, %v399_v59  ;;  %v427_v31 = vperm.slane %v419_v26, %v2573_v29  ;;  %v428_v23 = vrot.slane %v415_v17, 4 }
 0x249   :  { %v675_v35 = vperm.slane %v667_v28, %v2573_v29  ;;  %v688_v37 = vrot.slane %v671_v22, 4  ;;  %v693_v36 = vsel %vm336_vm8, 0.0, %v692_v27  ;;  %v694_v38 = vrot.slane %v687_v25, 4 }
 0x24a   :  { %v423_v39 = vperm.slane %v417_v30, %v2573_v29  ;;  %v429_v40 = vsel %vm336_vm8, %v428_v23, %v403_v60  ;;  %v431_v41 = vsel %vm336_vm8, %v415_v17, %v430_v2  ;;  %v442_v45 = vrot.slane %v427_v31, 4 }
 0x24b   :  { %v2678_v47 = vsel %vm336_vm8, 0.0, %v688_v37  ;;  %v690_v50 = vrot.slane %v675_v35, 4  ;;  %v695_v51 = vsel %vm336_vm8, 0.0, %v694_v38  ;;  %v761_v52 = vsel %vm336_vm8, %v694_v38, %v683_v16 }
 0x24c   :  { %v2683_v42 = vperm.slane %v761_v52, %v2562_v13  ;;  %v766_v54 = vrot.slane %v695_v51, 4  ;;  %v435_v55 = vperm.slane %v429_v40, %v2573_v29  ;;  %v439_v56 = vperm.slane %v431_v41, %v2573_v29 }
 0x24d   :  { %v2688_v58 = vsel %vm336_vm8, 0.0, %v690_v50  ;;  %v2691_v59 = vsel %vm336_vm8, %v690_v50, %v671_v22  ;;  %v440_v60 = vrot.slane %v423_v39, 4  ;;  %v443_v61 = vsel %vm336_vm8, 0.0, %v442_v45 }
 0x24e   :  { %v755_v62 = vrot.slane %v2688_v58, 4  ;;  %v767_v63 = vsel %vm336_vm8, %v766_v54, %v693_v36  ;;  %v786_v0 = vrot.slane %v2683_v42, 4  ;;  %v444_v1 = vrot.slane %v435_v55, 4 }
 0x24f   :  { %v2698_v2 = vperm.slane %v767_v63, %v2562_v13  ;;  %v441_v32 = vsel %vm336_vm8, 0.0, %v440_v60  ;;  %v446_v4 = vrot.slane %v439_v56, 4  ;;  %v502_v5 = vsel %vm336_vm8, %v442_v45, %v423_v39 }
 0x250   :  { %v445_v6 = vsel %vm336_vm8, 0.0, %v444_v1  ;;  %v2704_v9 = vperm.slane %v502_v5, %v2562_v13  ;;  %v507_v11 = vrot.slane %v443_v61, 4  ;;  %v706_v12 = vperm.slane %v702_v3, %v2562_v13 }
 0x251   :  { %v447_v33 = vsel %vm336_vm8, 0.0, %v446_v4  ;;  %v513_v14 = vsel %vm336_vm8, %v446_v4, %v435_v55  ;;  %v717_v15 = vperm.slane %v2609_v24, %v2562_v13  ;;  %v720_v16 = vrot.slane %v2661_v18, 4 }
 0x252   :  { %v508_v17 = vsel %vm336_vm8, %v507_v11, %v441_v32  ;;  %v2714_v19 = vperm.slane %v513_v14, %v2562_v13  ;;  %v518_v20 = vrot.slane %v447_v33, 4  ;;  %v526_v7 = vrot.slane %v2704_v9, 4 }
 0x253   :  { %v2718_v8 = vperm.slane %v508_v17, %v2562_v13  ;;  %v721_v3 = vsel %vm336_vm8, %v706_v12, %v720_v16  ;;  %v732_v22 = vrot.slane %v2606_v21, 4  ;;  %v718_v26 = vrot.slane %v706_v12, 4 }
 0x254   :  { %v519_v24 = vsel %vm336_vm8, %v518_v20, %v445_v6  ;;  %v538_v25 = vrot.slane %v2714_v19, 4  ;;  %v729_v27 = vperm.slane %v721_v3, %v2573_v29  ;;  %v730_v31 = vrot.slane %v717_v15, 4 }
 0x255   :  { %v2726_v28 = vperm.slane %v519_v24, %v2562_v13  ;;  %v733_v30 = vsel %vm336_vm8, %v717_v15, %v732_v22  ;;  %v454_v23 = vsel %vm336_vm8, %v453_v49, %v2614_v34  ;;  %v719_v37 = vsel %vm336_vm8, %v718_v26, %v2661_v18 }
 0x256   :  { %v741_v35 = vperm.slane %v733_v30, %v2573_v29  ;;  %v748_v36 = vrot.slane %v729_v27, 4  ;;  %v458_v38 = vperm.slane %v454_v23, %v2562_v13  ;;  %v725_v39 = vperm.slane %v719_v37, %v2573_v29 }
 0x257   :  { %v731_v40 = vsel %vm336_vm8, %v730_v31, %v2606_v21  ;;  %v472_v41 = vrot.slane %v2629_v48, 4  ;;  %v485_v34 = vsel %vm336_vm8, %v2641_v57, %v484_v53  ;;  %v482_v14 = vrot.slane %v2641_v57, 4 }
 0x258   :  { %v746_v43 = vrot.slane %v741_v35, 4  ;;  %v737_v49 = vperm.slane %v731_v40, %v2573_v29  ;;  %v749_v18 = vsel %vm336_vm8, %v741_v35, %v748_v36  ;;  %v493_v45 = vperm.slane %v485_v34, %v2573_v29 }
 0x259   :  { %v807_v50 = vpack.c.bf16 %v749_v18, %v749_v18  ;;  %v744_v51 = vrot.slane %v725_v39, 4  ;;  %v473_v52 = vsel %vm336_vm8, %v458_v38, %v472_v41  ;;  %v470_v54 = vrot.slane %v458_v38, 4 }
 0x25a   :  { %v747_v21 = vsel %vm336_vm8, %v746_v43, %v729_v27  ;;  %v742_v55 = vrot.slane %v737_v49, 4  ;;  %v481_v56 = vperm.slane %v473_v52, %v2573_v29  ;;  %v498_v60 = vrot.slane %v493_v45, 4 }
 0x25b   :  { %v806_v61 = vpack.c.bf16 %v747_v21, %v747_v21  ;;  %v1122_v53 = vsel %vm1060_vm9, %v807_v50, 0  ;;  %v745_v63 = vsel %vm336_vm8, %v737_v49, %v744_v51  ;;  %v471_v1 = vsel %vm336_vm8, %v470_v54, %v2629_v48 }
 0x25c   :  { %v743_v32 = vsel %vm336_vm8, %v742_v55, %v725_v39  ;;  %1131 = vmatpush.bf16.xpose.msrb.mxu2 %v1122_v53  ;;  %v805_v4 = vpack.c.bf16 %v745_v63, %v745_v63  ;;  %v499_v5 = vsel %vm336_vm8, %v498_v60, %v481_v56  ;;  %v477_v6 = vperm.slane %v471_v1, %v2573_v29 }
 0x25d   :  { %v1103_v11 = vsel %vm1060_vm9, %v806_v61, 0  ;;  %v804_v12 = vpack.c.bf16 %v743_v32, %v743_v32  ;;  %v558_v33 = vpack.c.bf16 %v499_v5, %v499_v5  ;;  %v500_v17 = vrot.slane %v481_v56, 4 }
 0x25e   :  { %1112 = vmatpush.bf16.xpose.msrb.mxu1 %v1103_v11  ;;  %v1084_v15 = vsel %vm1060_vm9, %v805_v4, 0  ;;  %v496_v16 = vrot.slane %v477_v6, 4  ;;  %v754_v48 = vperm.slane %v2691_v59, %v2562_v13  ;;  %v483_v3 = vsel %vm336_vm8, %v482_v14, %v2626_v46 }
 0x25f   :  { %v1065_v20 = vsel %vm1060_vm9, %v804_v12, 0  ;;  %1093 = vmatpush.bf16.xpose.msrb.mxu0 %v1084_v15  ;;  %v756_v22 = vsel %vm336_vm8, %v755_v62, %v2678_v47  ;;  %v787_v57 = vsel %vm336_vm8, %v2698_v2, %v786_v0  ;;  %v489_v24 = vperm.slane %v483_v3, %v2573_v29  ;;  %v310_v3 = vpop.f32.mrf.mxu2 }
 0x260   :  { %1074 = vmatpush.bf16.xpose.msra.mxu3 %v1065_v20  ;;  %v501_v59 = vsel %vm336_vm8, %v493_v45, %v500_v17  ;;  %v760_v27 = vperm.slane %v756_v22, %v2562_v13  ;;  %v774_v26 = vrot.slane %v754_v48, 4  ;;  %v795_v46 = vperm.slane %v787_v57, %v2573_v29 }
 0x261   :  { %v559_v30 = vpack.c.bf16 %v501_v59, %v501_v59  ;;  %v784_v58 = vrot.slane %v2698_v2, 4  ;;  %v527_v47 = vsel %vm336_vm8, %v2718_v8, %v526_v7  ;;  %v494_v62 = vrot.slane %v489_v24, 4 }
 0x262   :  { %v497_v0 = vsel %vm336_vm8, %v489_v24, %v496_v16  ;;  %v775_v31 = vsel %vm336_vm8, %v760_v27, %v774_v26  ;;  %v772_v23 = vrot.slane %v760_v27, 4  ;;  %v800_v36 = vrot.slane %v795_v46, 4 }
 0x263   :  { %2016 = vmatmul.msk.bf16.vlgmr.msrb.gmra.mxu2 %vm1060_vm9, %v559_v30  ;;  %v557_v35 = vpack.c.bf16 %v497_v0, %v497_v0  ;;  %v783_v37 = vperm.slane %v775_v31, %v2573_v29  ;;  %v785_v2 = vsel %vm336_vm8, %v784_v58, %v2683_v42  ;;  %v495_v38 = vsel %vm336_vm8, %v494_v62, %v477_v6 }
 0x264   :  { %v773_v39 = vsel %vm336_vm8, %v772_v23, %v754_v48  ;;  %v791_v7 = vperm.slane %v785_v2, %v2573_v29  ;;  %v535_v40 = vperm.slane %v527_v47, %v2573_v29  ;;  %v556_v41 = vpack.c.bf16 %v495_v38, %v495_v38 }
 0x265   :  { %2015 = vmatmul.msk.bf16.vlgmr.msrb.gmra.mxu1 %vm1060_vm9, %v558_v33  ;;  %v801_v34 = vsel %vm336_vm8, %v800_v36, %v783_v37  ;;  %v779_v43 = vperm.slane %v773_v39, %v2573_v29  ;;  %v802_v49 = vrot.slane %v783_v37, 4  ;;  %v539_v45 = vsel %vm336_vm8, %v2726_v28, %v538_v25 }
 0x266   :  { %2014 = vmatmul.msk.bf16.vlgmr.msrb.gmra.mxu0 %vm1060_vm9, %v557_v35  ;;  %v810_v18 = vpack.c.bf16 %v801_v34, %v801_v34  ;;  %v796_v42 = vrot.slane %v791_v7, 4  ;;  %v524_v50 = vrot.slane %v2718_v8, 4  ;;  %v547_v54 = vperm.slane %v539_v45, %v2573_v29 }
 0x267   :  { %2013 = vmatmul.msk.bf16.vlgmr.msra.gmra.mxu3 %vm1060_vm9, %v556_v41  ;;  %v798_v51 = vrot.slane %v779_v43, 4  ;;  %v803_v52 = vsel %vm336_vm8, %v795_v46, %v802_v49  ;;  %v536_v21 = vrot.slane %v2726_v28, 4  ;;  %v554_v32 = vrot.slane %v535_v40, 4  ;;  %v312_v22 = vpop.f32.mrf.mxu2 }
 0x268   :  { %v1179_v55 = vsel %vm1060_vm9, %v810_v18, 0  ;;  %v797_v56 = vsel %vm336_vm8, %v796_v42, %v779_v43  ;;  %v811_v60 = vpack.c.bf16 %v803_v52, %v803_v52  ;;  %v525_v61 = vsel %vm336_vm8, %v524_v50, %v2704_v9 }
 0x269   :  { %1188 = vmatpush.bf16.xpose.msra.mxu1 %v1179_v55  ;;  %v808_v25 = vpack.c.bf16 %v797_v56, %v797_v56  ;;  %v799_v8 = vsel %vm336_vm8, %v791_v7, %v798_v51  ;;  %v531_v53 = vperm.slane %v525_v61, %v2573_v29  ;;  %v537_v28 = vsel %vm336_vm8, %v536_v21, %v2714_v19 }
 0x26a   :  { %v1198_v63 = vsel %vm1060_vm9, %v811_v60, 0  ;;  %v809_v1 = vpack.c.bf16 %v799_v8, %v799_v8  ;;  %v543_v5 = vperm.slane %v537_v28, %v2573_v29  ;;  %v552_v6 = vrot.slane %v547_v54, 4 }
 0x26b   :  { %v1141_v4 = vsel %vm1060_vm9, %v808_v25, 0  ;;  %1207 = vmatpush.bf16.xpose.msra.mxu2 %v1198_v63  ;;  %v550_v11 = vrot.slane %v531_v53, 4  ;;  %v555_v33 = vsel %vm336_vm8, %v547_v54, %v554_v32  ;;  %v288_v49 = vperm.slane %v2527_v44, 4 }
 0x26c   :  { %1150 = vmatpush.bf16.xpose.msrb.mxu3 %v1141_v4  ;;  %v1160_v9 = vsel %vm1060_vm9, %v809_v1, 0  ;;  %v548_v12 = vrot.slane %v543_v5, 4  ;;  %v553_v14 = vsel %vm336_vm8, %v552_v6, %v535_v40  ;;  %v563_v15 = vpack.c.bf16 %v555_v33, %v555_v33 }
 0x26d   :  { %1169 = vmatpush.bf16.xpose.msra.mxu0 %v1160_v9  ;;  %v551_v19 = vsel %vm336_vm8, %v543_v5, %v550_v11  ;;  %v562_v17 = vpack.c.bf16 %v553_v14, %v553_v14  ;;  %v2838_v18 = vadd.f32 %v312_v22, %v288_v49  ;;  %v2840_v42 = vadd.f32 %v310_v3, %v288_v49 }
 0x26e   :  { %v549_v16 = vsel %vm336_vm8, %v548_v12, %v531_v53  ;;  %v561_v48 = vpack.c.bf16 %v551_v19, %v551_v19 }
 0x26f   :  { %v560_v20 = vpack.c.bf16 %v549_v16, %v549_v16  ;;  %v2096_v45 = vpack.i.bf16 %v2838_v18, %v2840_v42 }
 0x273   :  { %2020 = vmatmul.msk.bf16.vlgmr.msra.gmra.mxu2 %vm1060_vm9, %v563_v15 }
 0x275   :  { %2019 = vmatmul.msk.bf16.vlgmr.msra.gmra.mxu1 %vm1060_vm9, %v562_v17 }
 0x276   :  { %2018 = vmatmul.msk.bf16.vlgmr.msra.gmra.mxu0 %vm1060_vm9, %v561_v48 }
 0x277   :  { %2017 = vmatmul.msk.bf16.vlgmr.msrb.gmra.mxu3 %vm1060_vm9, %v560_v20 }
 0x2e2   :  { %v1114_v57 = vpop.f32.mrf.mxu1 }
 0x2e3   :  { %v1219_v24 = vsel %vm1060_vm9, %v1114_v57, -inf  ;;  %v1095_v59 = vpop.f32.mrf.mxu0 }
 0x2e4   :  { %1220 = vmax.xlane.f32.xlu0 %v1219_v24  ;;  %v1216_v27 = vsel %vm1060_vm9, %v1095_v59, -inf }
 0x2e5   :  { %1217 = vmax.xlane.f32.xlu2 %v1216_v27 }
 0x2e6   :  { %v1133_v26 = vpop.f32.mrf.mxu2 }
 0x2e7   :  { %v1222_v30 = vsel %vm1060_vm9, %v1133_v26, -inf }
 0x2e8   :  { %1223 = vmax.xlane.f32.xlu1 %v1222_v30 }
 0x2ea   :  { %v1076_v46 = vpop.f32.mrf.mxu3  ;;  %v1116_v58 = vpop.f32.mrf.mxu1 }
 0x2eb   :  { %v1097_v47 = vpop.f32.mrf.mxu0  ;;  %v1213_v62 = vsel %vm1060_vm9, %v1076_v46, -inf }
 0x2ed   :  { %1214 = vmax.xlane.f32.xlu2 %v1213_v62  ;;  %v890_v62 = vrot.slane %v2838_v18, 4 }
 0x2ee   :  { %v1135_v0 = vpop.f32.mrf.mxu2 }
 0x2f2   :  { %v1078_v31 = vpop.f32.mrf.mxu3  ;;  %v1190_v23 = vpop.f32.mrf.mxu1 }
 0x2f3   :  { %v2830_v35 = vpop.f32.mrf.mxu0  ;;  %v1231_v36 = vsel %vm1060_vm9, %v1190_v23, -inf }
 0x2f4   :  { %v1228_v37 = vsel %vm1060_vm9, %v2830_v35, -inf }
 0x2f5   :  { %1229 = vmax.xlane.f32.xlu1 %v1228_v37  ;;  %1232 = vmax.xlane.f32.xlu2 %v1231_v36 }
 0x2f6   :  { %v1209_v2 = vpop.f32.mrf.mxu2 }
 0x2f7   :  { %v1234_v38 = vsel %vm1060_vm9, %v1209_v2, -inf }
 0x2f8   :  { %1235 = vmax.xlane.f32.xlu0 %v1234_v38 }
 0x2fa   :  { %v1152_v39 = vpop.f32.mrf.mxu3  ;;  %v1192_v7 = vpop.f32.mrf.mxu1 }
 0x2fb   :  { %v1173_v40 = vpop.f32.mrf.mxu0  ;;  %v1225_v41 = vsel %vm1060_vm9, %v1152_v39, -inf }
 0x2fd   :  { %1226 = vmax.xlane.f32.xlu1 %v1225_v41 }
 0x2fe   :  { %v1211_v34 = vpop.f32.mrf.mxu2 }
 0x302   :  { %v1154_v43 = vpop.f32.mrf.mxu3 }
 0x30c   :  { %2097 = vrot.lane.b32.xlu0 %v2096_v45, %s2418_s20 }
 0x30d   :  { %2102 = vrot.lane.b32.xlu2 %v2096_v45, %s2417_s19 }
 0x316   :  { %2107 = vrot.lane.b32.xlu1 %v2096_v45, %s2416_s7 }
 0x357   :  { %v1221_v50 = vpop.xlane.xlu0 %1220 }
 0x358   :  { %v1239_v51 = vsub.f32 %v1114_v57, %v1221_v50  ;;  %v1218_v52 = vpop.xlane.xlu2 %1217 }
 0x359   :  { %v1238_v25 = vsub.f32 %v1095_v59, %v1218_v52 }
 0x35a   :  { %v1249_v54 = vmul.f32 1.442695, %v1239_v51 }
 0x35b   :  { %v1224_v21 = vpop.xlane.xlu1 %1223  ;;  %v1247_v1 = vmul.f32 1.442695, %v1238_v25 }
 0x35c   :  { %2132 = vpow2.f32 %v1249_v54  ;;  %v1240_v44 = vsub.f32 %v1133_v26, %v1224_v21 }
 0x35e   :  { %v1251_v55 = vmul.f32 1.442695, %v1240_v44 }
 0x360   :  { %2134 = vpow2.f32 %v1251_v55  ;;  %v1215_v56 = vpop.xlane.xlu2 %1214 }
 0x361   :  { %v1237_v60 = vsub.f32 %v1076_v46, %v1215_v56 }
 0x362   :  { %v2847_v61 = vpop.eup %2132 }
 0x363   :  { %v1245_v8 = vmul.f32 1.442695, %v1237_v60  ;;  %v1267_v53 = vsel %vm1060_vm9, %v2847_v61, 0.0 }
 0x364   :  { %1268 = vadd.xlane.f32.xlu1 %v1267_v53 }
 0x365   :  { %2136 = vpow2.f32 %v1245_v8 }
 0x366   :  { %v2851_v63 = vpop.eup %2134  ;;  %2138 = vpow2.f32 %v1247_v1 }
 0x367   :  { %v1270_v28 = vsel %vm1060_vm9, %v2851_v63, 0.0 }
 0x368   :  { %v1230_v32 = vpop.xlane.xlu1 %1229  ;;  %v1233_v4 = vpop.xlane.xlu2 %1232  ;;  %1271 = vadd.xlane.f32.xlu2 %v1270_v28 }
 0x369   :  { %v1243_v5 = vsub.f32 %v1190_v23, %v1233_v4  ;;  %v1242_v3 = vsub.f32 %v2830_v35, %v1230_v32  ;;  %v834_v23 = vrot.slane %v2840_v42, 4 }
 0x36b   :  { %v2855_v9 = vpop.eup %2136  ;;  %v1257_v6 = vmul.f32 1.442695, %v1243_v5  ;;  %v1236_v11 = vpop.xlane.xlu0 %1235  ;;  %v1255_v24 = vmul.f32 1.442695, %v1242_v3 }
 0x36c   :  { %v1244_v12 = vsub.f32 %v1209_v2, %v1236_v11  ;;  %v1261_v33 = vsel %vm1060_vm9, %v2855_v9, 0.0  ;;  %v2859_v19 = vpop.eup %2138 }
 0x36d   :  { %1262 = vadd.xlane.f32.xlu0 %v1261_v33  ;;  %2140 = vpow2.f32 %v1257_v6  ;;  %v1264_v20 = vsel %vm1060_vm9, %v2859_v19, 0.0 }
 0x36e   :  { %v1259_v14 = vmul.f32 1.442695, %v1244_v12 }
 0x370   :  { %v1227_v15 = vpop.xlane.xlu1 %1226  ;;  %2142 = vpow2.f32 %v1259_v14  ;;  %v2103_v59 = vpop.permute.xlu2 %2102 }
 0x371   :  { %v1241_v16 = vsub.f32 %v1152_v39, %v1227_v15  ;;  %v2105_v30 = vunpack.i.h.bf16 %v2103_v59  ;;  %v2104_v58 = vunpack.i.l.bf16 %v2103_v59 }
 0x373   :  { %v2861_v17 = vpop.eup %2140  ;;  %v1253_v48 = vmul.f32 1.442695, %v1241_v16  ;;  %v888_v47 = vrot.slane %v2105_v30, 4  ;;  %v832_v35 = vrot.slane %v2104_v58, 4  ;;  %v891_v37 = vsel %vm336_vm8, %v2105_v30, %v890_v62 }
 0x374   :  { %v1279_v22 = vsel %vm1060_vm9, %v2861_v17, 0.0  ;;  %v835_v2 = vsel %vm336_vm8, %v2104_v58, %v834_v23  ;;  %v899_v34 = vperm.slane %v891_v37, %v2562_v13 }
 0x375   :  { %1265 = vadd.xlane.f32.xlu0 %v1264_v20  ;;  %1280 = vadd.xlane.f32.xlu1 %v1279_v22  ;;  %2144 = vpow2.f32 %v1253_v48  ;;  %v889_v36 = vsel %vm336_vm8, %v888_v47, %v2838_v18  ;;  %v833_v40 = vsel %vm336_vm8, %v832_v35, %v2840_v42  ;;  %v843_v43 = vperm.slane %v835_v2, %v2562_v13 }
 0x376   :  { %v2868_v57 = vpop.eup %2142  ;;  %2146 = vpow2.f32 %v1255_v24  ;;  %v895_v41 = vperm.slane %v889_v36, %v2562_v13  ;;  %v839_v52 = vperm.slane %v833_v40, %v2562_v13  ;;  %v926_v55 = vrot.slane %v899_v34, 4 }
 0x377   :  { %v1282_v27 = vsel %vm1060_vm9, %v2868_v57, 0.0  ;;  %v870_v8 = vrot.slane %v843_v43, 4 }
 0x378   :  { %v914_v25 = vrot.slane %v895_v41, 4  ;;  %v858_v6 = vrot.slane %v839_v52, 4 }
 0x37b   :  { %v2872_v26 = vpop.eup %2144 }
 0x37c   :  { %v1273_v46 = vsel %vm1060_vm9, %v2872_v26, 0.0  ;;  %v2877_v31 = vpop.eup %2146 }
 0x37d   :  { %1283 = vadd.xlane.f32.xlu0 %v1282_v27  ;;  %1274 = vadd.xlane.f32.xlu2 %v1273_v46  ;;  %v1276_v7 = vsel %vm1060_vm9, %v2877_v31, 0.0 }
 0x37e   :  { %v2098_v0 = vpop.permute.xlu0 %2097 }
 0x37f   :  { %v2100_v38 = vunpack.i.h.bf16 %v2098_v0  ;;  %v2099_v39 = vunpack.i.l.bf16 %v2098_v0 }
 0x381   :  { %v902_v45 = vrot.slane %v2100_v38, 4  ;;  %v846_v18 = vrot.slane %v2099_v39, 4 }
 0x385   :  { %1277 = vadd.xlane.f32.xlu2 %v1276_v7 }
 0x388   :  { %v2108_v49 = vpop.permute.xlu1 %2107 }
 0x389   :  { %v2110_v50 = vunpack.i.h.bf16 %v2108_v49  ;;  %v2109_v51 = vunpack.i.l.bf16 %v2108_v49 }
 0x38b   :  { %v900_v54 = vrot.slane %v2110_v50, 4  ;;  %v903_v21 = vsel %vm336_vm8, %v2110_v50, %v902_v45  ;;  %v844_v44 = vrot.slane %v2109_v51, 4  ;;  %v847_v42 = vsel %vm336_vm8, %v2109_v51, %v846_v18 }
 0x38c   :  { %v911_v56 = vperm.slane %v903_v21, %v2562_v13  ;;  %v855_v60 = vperm.slane %v847_v42, %v2562_v13 }
 0x38d   :  { %v901_v53 = vsel %vm336_vm8, %v900_v54, %v2100_v38  ;;  %v845_v1 = vsel %vm336_vm8, %v844_v44, %v2099_v39 }
 0x38e   :  { %v907_v28 = vperm.slane %v901_v53, %v2562_v13  ;;  %v924_v32 = vrot.slane %v911_v56, 4  ;;  %v927_v4 = vsel %vm336_vm8, %v911_v56, %v926_v55  ;;  %v851_v5 = vperm.slane %v845_v1, %v2562_v13 }
 0x38f   :  { %v935_v11 = vperm.slane %v927_v4, %v2573_v29  ;;  %v868_v12 = vrot.slane %v855_v60, 4  ;;  %v871_v33 = vsel %vm336_vm8, %v855_v60, %v870_v8 }
 0x390   :  { %v912_v14 = vrot.slane %v907_v28, 4  ;;  %v915_v15 = vsel %vm336_vm8, %v907_v28, %v914_v25  ;;  %v925_v16 = vsel %vm336_vm8, %v924_v32, %v899_v34  ;;  %v856_v48 = vrot.slane %v851_v5, 4 }
 0x391   :  { %v923_v20 = vperm.slane %v915_v15, %v2573_v29  ;;  %v931_v3 = vperm.slane %v925_v16, %v2573_v29  ;;  %v942_v22 = vrot.slane %v935_v11, 4  ;;  %v859_v24 = vsel %vm336_vm8, %v851_v5, %v858_v6 }
 0x392   :  { %v913_v59 = vsel %vm336_vm8, %v912_v14, %v895_v41  ;;  %v857_v27 = vsel %vm336_vm8, %v856_v48, %v839_v52  ;;  %v867_v30 = vperm.slane %v859_v24, %v2573_v29  ;;  %v869_v46 = vsel %vm336_vm8, %v868_v12, %v843_v43 }
 0x393   :  { %v919_v58 = vperm.slane %v913_v59, %v2573_v29  ;;  %v938_v47 = vrot.slane %v923_v20, 4  ;;  %v940_v62 = vrot.slane %v931_v3, 4  ;;  %v943_v0 = vsel %vm336_vm8, 0.0, %v942_v22 }
 0x394   :  { %v1009_v23 = vsel %vm336_vm8, %v942_v22, %v931_v3  ;;  %v1014_v35 = vrot.slane %v943_v0, 4  ;;  %v863_v37 = vperm.slane %v857_v27, %v2573_v29  ;;  %v875_v36 = vperm.slane %v869_v46, %v2573_v29 }
 0x395   :  { %v936_v2 = vrot.slane %v919_v58, 4  ;;  %v939_v38 = vsel %vm336_vm8, 0.0, %v938_v47  ;;  %v941_v39 = vsel %vm336_vm8, 0.0, %v940_v62  ;;  %v1013_v7 = vperm.slane %v1009_v23, %v2562_v13 }
 0x396   :  { %v1003_v40 = vrot.slane %v939_v38, 4  ;;  %v879_v41 = vperm.slane %v871_v33, %v2573_v29  ;;  %v880_v34 = vrot.slane %v863_v37, 4  ;;  %v882_v43 = vrot.slane %v867_v30, 4 }
 0x397   :  { %v884_v49 = vrot.slane %v875_v36, 4  ;;  %v937_v45 = vsel %vm336_vm8, 0.0, %v936_v2  ;;  %v998_v18 = vsel %vm336_vm8, %v938_v47, %v919_v58  ;;  %v1015_v50 = vsel %vm336_vm8, %v1014_v35, %v941_v39 }
 0x398   :  { %v883_v51 = vsel %vm336_vm8, 0.0, %v882_v43  ;;  %v886_v52 = vrot.slane %v879_v41, 4  ;;  %v881_v54 = vsel %vm336_vm8, 0.0, %v880_v34  ;;  %v944_v21 = vsel %vm336_vm8, %v882_v43, %v863_v37 }
 0x399   :  { %v885_v44 = vsel %vm336_vm8, 0.0, %v884_v49  ;;  %v949_v42 = vrot.slane %v883_v51, 4  ;;  %v948_v55 = vperm.slane %v944_v21, %v2562_v13  ;;  %v1002_v56 = vperm.slane %v998_v18, %v2562_v13 }
 0x39a   :  { %v887_v60 = vsel %vm336_vm8, 0.0, %v886_v52  ;;  %v955_v25 = vsel %vm336_vm8, %v886_v52, %v875_v36  ;;  %v1004_v8 = vsel %vm336_vm8, %v1003_v40, %v937_v45  ;;  %v1019_v53 = vperm.slane %v1015_v50, %v2562_v13 }
 0x39b   :  { %v959_v1 = vperm.slane %v955_v25, %v2562_v13  ;;  %v960_v28 = vrot.slane %v887_v60, 4  ;;  %v950_v32 = vsel %vm336_vm8, %v949_v42, %v881_v54  ;;  %v968_v4 = vrot.slane %v948_v55, 4 }
 0x39c   :  { %v954_v5 = vperm.slane %v950_v32, %v2562_v13  ;;  %v1008_v6 = vperm.slane %v1004_v8, %v2562_v13  ;;  %v1022_v11 = vrot.slane %v1002_v56, 4  ;;  %v1034_v12 = vrot.slane %v1013_v7, 4 }
 0x39d   :  { %v961_v33 = vsel %vm336_vm8, %v960_v28, %v885_v44  ;;  %v980_v14 = vrot.slane %v959_v1, 4  ;;  %v1032_v15 = vrot.slane %v1019_v53, 4 }
 0x39e   :  { %v965_v16 = vperm.slane %v961_v33, %v2562_v13  ;;  %v969_v48 = vsel %vm336_vm8, %v954_v5, %v968_v4  ;;  %v1023_v20 = vsel %vm336_vm8, %v1008_v6, %v1022_v11  ;;  %v1035_v3 = vsel %vm336_vm8, %v1019_v53, %v1034_v12 }
 0x39f   :  { %v977_v22 = vperm.slane %v969_v48, %v2573_v29  ;;  %v1031_v24 = vperm.slane %v1023_v20, %v2573_v29  ;;  %v1043_v59 = vperm.slane %v1035_v3, %v2573_v29  ;;  %v966_v27 = vrot.slane %v954_v5, 4 }
 0x3a0   :  { %v981_v30 = vsel %vm336_vm8, %v965_v16, %v980_v14  ;;  %v978_v46 = vrot.slane %v965_v16, 4  ;;  %v1020_v58 = vrot.slane %v1008_v6, 4  ;;  %v1033_v47 = vsel %vm336_vm8, %v1032_v15, %v1013_v7 }
 0x3a1   :  { %v989_v62 = vperm.slane %v981_v30, %v2573_v29  ;;  %v1048_v0 = vrot.slane %v1043_v59, 4  ;;  %v967_v23 = vsel %vm336_vm8, %v966_v27, %v948_v55  ;;  %v996_v35 = vrot.slane %v977_v22, 4 }
 0x3a2   :  { %v973_v37 = vperm.slane %v967_v23, %v2573_v29  ;;  %v979_v36 = vsel %vm336_vm8, %v978_v46, %v959_v1  ;;  %v1021_v2 = vsel %vm336_vm8, %v1020_v58, %v1002_v56  ;;  %v1039_v38 = vperm.slane %v1033_v47, %v2573_v29 }
 0x3a3   :  { %v994_v39 = vrot.slane %v989_v62, 4  ;;  %v1049_v40 = vsel %vm336_vm8, %v1048_v0, %v1031_v24  ;;  %v985_v41 = vperm.slane %v979_v36, %v2573_v29  ;;  %v997_v7 = vsel %vm336_vm8, %v989_v62, %v996_v35 }
 0x3a4   :  { %v1058_v34 = vpack.c.bf16 %v1049_v40, %v1049_v40  ;;  %v1055_v43 = vpack.c.bf16 %v997_v7, %v997_v7  ;;  %v1027_v49 = vperm.slane %v1021_v2, %v2573_v29  ;;  %v1044_v45 = vrot.slane %v1039_v38, 4 }
 0x3a5   :  { %v995_v18 = vsel %vm336_vm8, %v994_v39, %v977_v22  ;;  %v990_v50 = vrot.slane %v985_v41, 4  ;;  %v1050_v51 = vrot.slane %v1031_v24, 4  ;;  %v992_v52 = vrot.slane %v973_v37, 4 }
 0x3a6   :  { %v1054_v54 = vpack.c.bf16 %v995_v18, %v995_v18  ;;  %v1428_v21 = vsel %vm1312_vm10, %v1058_v34, 0  ;;  %v1371_v44 = vsel %vm1312_vm10, %v1055_v43, 0  ;;  %v1045_v42 = vsel %vm336_vm8, %v1044_v45, %v1027_v49 }
 0x3a7   :  { %v991_v55 = vsel %vm336_vm8, %v990_v50, %v973_v37  ;;  %1380 = vmatpush.bf16.msrb.mxu2 %v1371_v44  ;;  %v1056_v56 = vpack.c.bf16 %v1045_v42, %v1045_v42  ;;  %v1051_v60 = vsel %vm336_vm8, %v1043_v59, %v1050_v51  ;;  %v993_v25 = vsel %vm336_vm8, %v985_v41, %v992_v52 }
 0x3a8   :  { %v1352_v8 = vsel %vm1312_vm10, %v1054_v54, 0  ;;  %v1052_v53 = vpack.c.bf16 %v991_v55, %v991_v55  ;;  %v1059_v1 = vpack.c.bf16 %v1051_v60, %v1051_v60  ;;  %v1053_v28 = vpack.c.bf16 %v993_v25, %v993_v25 }
 0x3a9   :  { %1361 = vmatpush.bf16.msrb.mxu1 %v1352_v8  ;;  %v1390_v32 = vsel %vm1312_vm10, %v1056_v56, 0  ;;  %v1046_v4 = vrot.slane %v1027_v49, 4 }
 0x3aa   :  { %v1314_v5 = vsel %vm1312_vm10, %v1052_v53, 0  ;;  %v1447_v6 = vsel %vm1312_vm10, %v1059_v1, 0  ;;  %v1333_v11 = vsel %vm1312_vm10, %v1053_v28, 0 }
 0x3ab   :  { %1323 = vmatpush.bf16.msra.mxu3 %v1314_v5  ;;  %1456 = vmatpush.bf16.msra.mxu2 %v1447_v6  ;;  %v1047_v12 = vsel %vm336_vm8, %v1039_v38, %v1046_v4 }
 0x3ac   :  { %1342 = vmatpush.bf16.msrb.mxu0 %v1333_v11  ;;  %v1057_v33 = vpack.c.bf16 %v1047_v12, %v1047_v12 }
 0x3ad   :  { %1437 = vmatpush.bf16.msra.mxu1 %v1428_v21 }
 0x3ae   :  { %v1409_v14 = vsel %vm1312_vm10, %v1057_v33, 0 }
 0x3af   :  { %1399 = vmatpush.bf16.msrb.mxu3 %v1390_v32 }
 0x3b0   :  { %1418 = vmatpush.bf16.msra.mxu0 %v1409_v14 }
 0x3d7   :  { %v1269_v15 = vpop.xlane.xlu1 %1268 }
 0x3d8   :  { %2148 = vrcp.f32 %v1269_v15 }
 0x3db   :  { %v1272_v16 = vpop.xlane.xlu2 %1271 }
 0x3dc   :  { %2150 = vrcp.f32 %v1272_v16 }
 0x3de   :  { %v2149_v48 = vpop.eup %2148 }
 0x3df   :  { %v1295_v20 = vmul.f32 %v2149_v48, %v2847_v61 }
 0x3e0   :  { %v1263_v3 = vpop.xlane.xlu0 %1262 }
 0x3e1   :  { %v1303_v22 = vpack.c.bf16 %v1295_v20, %v1295_v20  ;;  %2152 = vrcp.f32 %v1263_v3 }
 0x3e2   :  { %v2151_v24 = vpop.eup %2150 }
 0x3e3   :  { %v1296_v59 = vmul.f32 %v2151_v24, %v2851_v63  ;;  %2023 = vmatmul.msk.bf16.vlgmr.msrb.gmra.mxu1 %vm1060_vm9, %v1303_v22 }
 0x3e5   :  { %v1304_v27 = vpack.c.bf16 %v1296_v59, %v1296_v59 }
 0x3e7   :  { %v2153_v30 = vpop.eup %2152  ;;  %2024 = vmatmul.msk.bf16.vlgmr.msrb.gmra.mxu2 %vm1060_vm9, %v1304_v27 }
 0x3e8   :  { %v1293_v46 = vmul.f32 %v2153_v30, %v2855_v9  ;;  %v1266_v58 = vpop.xlane.xlu0 %1265  ;;  %v1281_v47 = vpop.xlane.xlu1 %1280 }
 0x3e9   :  { %2154 = vrcp.f32 %v1266_v58 }
 0x3ea   :  { %v1301_v62 = vpack.c.bf16 %v1293_v46, %v1293_v46  ;;  %2156 = vrcp.f32 %v1281_v47 }
 0x3ec   :  { %2021 = vmatmul.msk.bf16.vlgmr.msra.gmra.mxu3 %vm1060_vm9, %v1301_v62 }
 0x3ef   :  { %v2155_v61 = vpop.eup %2154 }
 0x3f0   :  { %v2157_v0 = vpop.eup %2156  ;;  %v1294_v23 = vmul.f32 %v2155_v61, %v2859_v19  ;;  %v1284_v63 = vpop.xlane.xlu0 %1283 }
 0x3f1   :  { %v1299_v35 = vmul.f32 %v2157_v0, %v2861_v17  ;;  %2158 = vrcp.f32 %v1284_v63  ;;  %v1275_v36 = vpop.xlane.xlu2 %1274 }
 0x3f2   :  { %v1302_v37 = vpack.c.bf16 %v1294_v23, %v1294_v23  ;;  %2160 = vrcp.f32 %v1275_v36 }
 0x3f3   :  { %v1307_v2 = vpack.c.bf16 %v1299_v35, %v1299_v35 }
 0x3f4   :  { %2022 = vmatmul.msk.bf16.vlgmr.msrb.gmra.mxu0 %vm1060_vm9, %v1302_v37 }
 0x3f5   :  { %2027 = vmatmul.msk.bf16.vlgmr.msra.gmra.mxu1 %vm1060_vm9, %v1307_v2 }
 0x3f7   :  { %v2159_v9 = vpop.eup %2158 }
 0x3f8   :  { %v1300_v38 = vmul.f32 %v2159_v9, %v2868_v57  ;;  %v2161_v39 = vpop.eup %2160 }
 0x3f9   :  { %v1297_v41 = vmul.f32 %v2161_v39, %v2872_v26  ;;  %v1278_v19 = vpop.xlane.xlu2 %1277 }
 0x3fa   :  { %v1308_v40 = vpack.c.bf16 %v1300_v38, %v1300_v38  ;;  %2162 = vrcp.f32 %v1278_v19 }
 0x3fb   :  { %v1305_v7 = vpack.c.bf16 %v1297_v41, %v1297_v41 }
 0x3fc   :  { %2028 = vmatmul.msk.bf16.vlgmr.msra.gmra.mxu2 %vm1060_vm9, %v1308_v40 }
 0x3fd   :  { %2025 = vmatmul.msk.bf16.vlgmr.msrb.gmra.mxu3 %vm1060_vm9, %v1305_v7 }
 0x400   :  { %v2163_v17 = vpop.eup %2162 }
 0x401   :  { %v1298_v34 = vmul.f32 %v2163_v17, %v2877_v31 }
 0x403   :  { %v1306_v43 = vpack.c.bf16 %v1298_v34, %v1298_v34 }
 0x405   :  { %2026 = vmatmul.msk.bf16.vlgmr.msra.gmra.mxu0 %vm1060_vm9, %v1306_v43 }
 0x460   :  { %v1363_v49 = vpop.f32.mrf.mxu1 }
 0x461   :  { %v1462_v18 = vrot.slane %v1363_v49, 4 }
 0x468   :  { %v1365_v45 = vpop.f32.mrf.mxu1 }
 0x46a   :  { %v1382_v57 = vpop.f32.mrf.mxu2 }
 0x46b   :  { %v1474_v51 = vrot.slane %v1382_v57, 4 }
 0x46f   :  { %v1325_v50 = vpop.f32.mrf.mxu3 }
 0x470   :  { %v1463_v26 = vsel %vm336_vm8, %v1462_v18, %v1325_v50  ;;  %v1464_v52 = vrot.slane %v1325_v50, 4 }
 0x471   :  { %v1469_v54 = vperm.slane %v1463_v26, %v2562_v13  ;;  %v1344_v21 = vpop.f32.mrf.mxu0 }
 0x472   :  { %v1465_v44 = vsel %vm336_vm8, %v1363_v49, %v1464_v52  ;;  %v1475_v42 = vsel %vm336_vm8, %v1474_v51, %v1344_v21  ;;  %v1476_v31 = vrot.slane %v1344_v21, 4  ;;  %v1439_v55 = vpop.f32.mrf.mxu1  ;;  %v1384_v56 = vpop.f32.mrf.mxu2 }
 0x473   :  { %v1473_v60 = vperm.slane %v1465_v44, %v2562_v13  ;;  %v1488_v25 = vrot.slane %v1469_v54, 4  ;;  %v1481_v8 = vperm.slane %v1475_v42, %v2562_v13  ;;  %v1518_v2 = vrot.slane %v1439_v55, 4 }
 0x474   :  { %v1477_v53 = vsel %vm336_vm8, %v1382_v57, %v1476_v31 }
 0x475   :  { %v1500_v1 = vrot.slane %v1473_v60, 4  ;;  %v1485_v28 = vperm.slane %v1477_v53, %v2562_v13  ;;  %v1486_v32 = vrot.slane %v1481_v8, 4  ;;  %v1489_v4 = vsel %vm336_vm8, %v1481_v8, %v1488_v25 }
 0x476   :  { %v1497_v5 = vperm.slane %v1489_v4, %v2573_v29 }
 0x477   :  { %v1487_v6 = vsel %vm336_vm8, %v1486_v32, %v1469_v54  ;;  %v1498_v11 = vrot.slane %v1485_v28, 4  ;;  %v1501_v12 = vsel %vm336_vm8, %v1485_v28, %v1500_v1  ;;  %v1327_v33 = vpop.f32.mrf.mxu3 }
 0x478   :  { %v1493_v14 = vperm.slane %v1487_v6, %v2573_v29  ;;  %v1509_v15 = vperm.slane %v1501_v12, %v2573_v29  ;;  %v1512_v16 = vrot.slane %v1497_v5, 4 }
 0x479   :  { %v1499_v48 = vsel %vm336_vm8, %v1498_v11, %v1473_v60  ;;  %v1346_v20 = vpop.f32.mrf.mxu0 }
 0x47a   :  { %v1505_v3 = vperm.slane %v1499_v48, %v2573_v29  ;;  %v1510_v22 = vrot.slane %v1493_v14, 4  ;;  %v1513_v24 = vsel %vm336_vm8, 0.0, %v1512_v16  ;;  %v1516_v59 = vrot.slane %v1509_v15, 4  ;;  %v1441_v27 = vpop.f32.mrf.mxu1 }
 0x47b   :  { %v1579_v30 = vrot.slane %v1513_v24, 4  ;;  %v1574_v0 = vsel %vm336_vm8, %v1512_v16, %v1493_v14 }
 0x47c   :  { %v1511_v46 = vsel %vm336_vm8, 0.0, %v1510_v22  ;;  %v1514_v58 = vrot.slane %v1505_v3, 4  ;;  %v1517_v47 = vsel %vm336_vm8, 0.0, %v1516_v59  ;;  %v1585_v63 = vsel %vm336_vm8, %v1516_v59, %v1505_v3 }
 0x47d   :  { %v1580_v62 = vsel %vm336_vm8, %v1579_v30, %v1511_v46  ;;  %v1590_v61 = vrot.slane %v1517_v47, 4  ;;  %v1578_v39 = vperm.slane %v1574_v0, %v2562_v13  ;;  %v1589_v7 = vperm.slane %v1585_v63, %v2562_v13 }
 0x47e   :  { %v1515_v23 = vsel %vm336_vm8, 0.0, %v1514_v58  ;;  %v1584_v36 = vperm.slane %v1580_v62, %v2562_v13 }
 0x47f   :  { %v1458_v35 = vpop.f32.mrf.mxu2  ;;  %v1591_v37 = vsel %vm336_vm8, %v1590_v61, %v1515_v23  ;;  %v1598_v50 = vrot.slane %v1578_v39, 4  ;;  %v1610_v21 = vrot.slane %v1589_v7, 4 }
 0x480   :  { %v1530_v9 = vrot.slane %v1458_v35, 4  ;;  %v1595_v38 = vperm.slane %v1591_v37, %v2562_v13  ;;  %v1401_v40 = vpop.f32.mrf.mxu3  ;;  %v1596_v18 = vrot.slane %v1584_v36, 4 }
 0x481   :  { %v1519_v41 = vsel %vm336_vm8, %v1518_v2, %v1401_v40  ;;  %v1520_v19 = vrot.slane %v1401_v40, 4  ;;  %v1599_v5 = vsel %vm336_vm8, %v1584_v36, %v1598_v50 }
 0x482   :  { %v1608_v17 = vrot.slane %v1595_v38, 4  ;;  %v1525_v34 = vperm.slane %v1519_v41, %v2562_v13  ;;  %v1420_v43 = vpop.f32.mrf.mxu0  ;;  %v1597_v8 = vsel %vm336_vm8, %v1596_v18, %v1578_v39  ;;  %v1611_v16 = vsel %vm336_vm8, %v1595_v38, %v1610_v21 }
 0x483   :  { %v1521_v49 = vsel %vm336_vm8, %v1439_v55, %v1520_v19  ;;  %v1531_v45 = vsel %vm336_vm8, %v1530_v9, %v1420_v43  ;;  %v1532_v57 = vrot.slane %v1420_v43, 4  ;;  %v1603_v48 = vperm.slane %v1597_v8, %v2573_v29 }
 0x484   :  { %v1529_v51 = vperm.slane %v1521_v49, %v2562_v13  ;;  %v1544_v26 = vrot.slane %v1525_v34, 4  ;;  %v1537_v52 = vperm.slane %v1531_v45, %v2562_v13  ;;  %v1609_v44 = vsel %vm336_vm8, %v1608_v17, %v1589_v7 }
 0x485   :  { %v1533_v54 = vsel %vm336_vm8, %v1458_v35, %v1532_v57  ;;  %v1615_v53 = vperm.slane %v1609_v44, %v2573_v29  ;;  %v1607_v30 = vperm.slane %v1599_v5, %v2573_v29  ;;  %v1619_v35 = vperm.slane %v1611_v16, %v2573_v29 }
 0x486   :  { %v1556_v42 = vrot.slane %v1529_v51, 4  ;;  %v1541_v31 = vperm.slane %v1533_v54, %v2562_v13  ;;  %v1542_v56 = vrot.slane %v1537_v52, 4  ;;  %v1545_v55 = vsel %vm336_vm8, %v1537_v52, %v1544_v26 }
 0x487   :  { %v1460_v60 = vpop.f32.mrf.mxu2  ;;  %v1553_v25 = vperm.slane %v1545_v55, %v2573_v29  ;;  %v1620_v33 = vrot.slane %v1615_v53, 4  ;;  %v1626_v38 = vrot.slane %v1607_v30, 4  ;;  %v1624_v43 = vrot.slane %v1619_v35, 4 }
 0x488   :  { %v1543_v1 = vsel %vm336_vm8, %v1542_v56, %v1525_v34  ;;  %v1554_v28 = vrot.slane %v1541_v31, 4  ;;  %v1557_v32 = vsel %vm336_vm8, %v1541_v31, %v1556_v42  ;;  %v1403_v4 = vpop.f32.mrf.mxu3  ;;  %v1622_v50 = vrot.slane %v1603_v48, 4 }
 0x489   :  { %v1549_v6 = vperm.slane %v1543_v1, %v2573_v29  ;;  %v1565_v11 = vperm.slane %v1557_v32, %v2573_v29  ;;  %v1568_v12 = vrot.slane %v1553_v25, 4  ;;  %v3042_v46 = vsel %vm336_vm8, %v1620_v33, %v1603_v48  ;;  %v2064_v32 = vld [vmem:[#allocation11] sm:$0xff] }
 0x48a   :  { %v1555_v14 = vsel %vm336_vm8, %v1554_v28, %v1529_v51  ;;  %v1422_v15 = vpop.f32.mrf.mxu0  ;;  %v1625_v31 = vsel %vm336_vm8, %v1624_v43, %v1607_v30  ;;  %v1623_v55 = vsel %vm336_vm8, %v1615_v53, %v1622_v50 }
 0x48b   :  { %v1561_v20 = vperm.slane %v1555_v14, %v2573_v29  ;;  %v1566_v3 = vrot.slane %v1549_v6, 4  ;;  %v1569_v22 = vsel %vm336_vm8, 0.0, %v1568_v12  ;;  %v1572_v24 = vrot.slane %v1565_v11, 4 }
 0x48c   :  { %v1628_v59 = vsel %vm336_vm8, %v1568_v12, %v1549_v6  ;;  %v1633_v27 = vrot.slane %v1569_v22, 4 }
 0x48d   :  { %v1567_v58 = vsel %vm336_vm8, 0.0, %v1566_v3  ;;  %v1570_v47 = vrot.slane %v1561_v20, 4  ;;  %v1573_v62 = vsel %vm336_vm8, 0.0, %v1572_v24  ;;  %v1632_v61 = vperm.slane %v1628_v59, %v2562_v13 }
 0x48e   :  { %v1634_v0 = vsel %vm336_vm8, %v1633_v27, %v1567_v58  ;;  %v1639_v23 = vsel %vm336_vm8, %v1572_v24, %v1561_v20  ;;  %v1644_v63 = vrot.slane %v1573_v62, 4  ;;  %v3075_v27 = vld [vmem:[#allocation5] sm:$0xff]  ;;  %v2173_v62 = vld [vmem:[#allocation2] sm:$0xff] }
 0x48f   :  { %v1638_v37 = vperm.slane %v1634_v0, %v2562_v13  ;;  %v1652_v36 = vrot.slane %v1632_v61, 4  ;;  %v1571_v2 = vsel %vm336_vm8, 0.0, %v1570_v47  ;;  %v1643_v9 = vperm.slane %v1639_v23, %v2562_v13 }
 0x490   :  { %v1645_v39 = vsel %vm336_vm8, %v1644_v63, %v1571_v2  ;;  %v1719_v30 = vperm.slane %v3075_v27, 5  ;;  %v2174_v63 = vld [vmem:[#allocation2 + $0x8] sm:$0xff] }
 0x491   :  { %v1649_v40 = vperm.slane %v1645_v39, %v2562_v13  ;;  %v1653_v41 = vsel %vm336_vm8, %v1638_v37, %v1652_v36  ;;  %v1664_v19 = vrot.slane %v1643_v9, 4  ;;  %v1650_v7 = vrot.slane %v1638_v37, 4 }
 0x492   :  { %v1661_v17 = vperm.slane %v1653_v41, %v2573_v29  ;;  %v1627_v13 = vsel %vm336_vm8, %v1619_v35, %v1626_v38 }
 0x493   :  { %v1665_v34 = vsel %vm336_vm8, %v1649_v40, %v1664_v19  ;;  %v1651_v49 = vsel %vm336_vm8, %v1650_v7, %v1632_v61  ;;  %v1662_v45 = vrot.slane %v1649_v40, 4 }
 0x494   :  { %v1673_v57 = vperm.slane %v1665_v34, %v2573_v29  ;;  %v1680_v18 = vrot.slane %v1661_v17, 4  ;;  %v1657_v51 = vperm.slane %v1651_v49, %v2573_v29 }
 0x495   :  { %v1663_v26 = vsel %vm336_vm8, %v1662_v45, %v1643_v9  ;;  %v2067_v45 = vld [vmem:[#allocation13 + $0x8] sm:$0xff] }
 0x496   :  { %v1681_v52 = vsel %vm336_vm8, %v1673_v57, %v1680_v18  ;;  %v1678_v54 = vrot.slane %v1673_v57, 4  ;;  %v1669_v21 = vperm.slane %v1663_v26, %v2573_v29  ;;  %v1676_v44 = vrot.slane %v1657_v51, 4  ;;  %v2065_v29 = vld [vmem:[#allocation11 + $0x8] sm:$0xff]  ;;  %1828 = vmatpush.bf16.msrb.mxu0 %v2067_v45  ;;  %v2066_v57 = vld [vmem:[#allocation13] sm:$0xff] }
 0x497   :  { %v2121_v42 = vpack.i.bf16 %v1681_v52, %v1627_v13  ;;  %1741 = vmatpush.bf16.msra.mxu3 %v2065_v29  ;;  %v1798_v29 = vperm.slane %v3075_v27, 7 }
 0x498   :  { %v1679_v56 = vsel %vm336_vm8, %v1678_v54, %v1661_v17  ;;  %v1674_v60 = vrot.slane %v1669_v21, 4  ;;  %v1677_v25 = vsel %vm336_vm8, %v1669_v21, %v1676_v44 }
 0x499   :  { %2122 = vrot.lane.b32.xlu2 %v2121_v42, %s2421_s23  ;;  %v2116_v8 = vpack.i.bf16 %v1679_v56, %v1625_v31  ;;  %v2111_v1 = vpack.i.bf16 %v1677_v25, %v1623_v55 }
 0x49a   :  { %v1675_v28 = vsel %vm336_vm8, %v1674_v60, %v1657_v51  ;;  %1829 = vmatpush.bf16.msrb.mxu0 %v2066_v57 }
 0x49b   :  { %2117 = vrot.lane.b32.xlu1 %v2116_v8, %s2422_s3  ;;  %2112 = vrot.lane.b32.xlu0 %v2111_v1, %s2405_s11 }
 0x49c   :  { %1742 = vmatpush.bf16.msra.mxu3 %v2064_v32 }
 0x4f3   :  { %v2123_v4 = vpop.permute.xlu2 %2122 }
 0x4f4   :  { %v2125_v14 = vunpack.i.h.bf16 %v2123_v4  ;;  %v2124_v15 = vunpack.i.l.bf16 %v2123_v4 }
 0x50d   :  { %v2118_v5 = vpop.permute.xlu1 %2117  ;;  %v2113_v53 = vpop.permute.xlu0 %2112 }
 0x50e   :  { %v2120_v6 = vunpack.i.h.bf16 %v2118_v5  ;;  %v2119_v11 = vunpack.i.l.bf16 %v2118_v5  ;;  %v2115_v12 = vunpack.i.h.bf16 %v2113_v53  ;;  %v2114_v33 = vunpack.i.l.bf16 %v2113_v53 }
 0x510   :  { %v1706_v16 = vsel %vm1060_vm9, %v3042_v46, %v2114_v33  ;;  %v1707_v48 = vsel %vm1060_vm9, %v1675_v28, %v2115_v12  ;;  %v3097_v12 = vld [vmem:[#allocation5 + $0x8] sm:$0x3] }
 0x511   :  { %v1709_v20 = vsel %vm1708_vm11, %v1706_v16, %v2119_v11  ;;  %v1710_v3 = vsel %vm1708_vm11, %v1707_v48, %v2120_v6  ;;  %v1806_v33 = vperm.slane %v3097_v12, 0 }
 0x512   :  { %v1712_v22 = vsel %vm1711_vm12, %v1709_v20, %v2124_v15  ;;  %v1713_v24 = vsel %vm1711_vm12, %v1710_v3, %v2125_v14 }
 0x513   :  { %v1714_v59 = vpack.c.bf16 %v1713_v24, %v1712_v22 }
 0x515   :  { %2037 = vmatmul.msk.bf16.vlgmr.msra.gmra.mxu3 %vm160_vm0, %v1714_v59 }
 0x598   :  { %v1744_v58 = vpop.f32.mrf.mxu3 }
 0x599   :  { %v1745_v47 = vadd.f32 %v1744_v58, %v1719_v30 }
 0x59b   :  { %v3078_v61 = vadd.f32 %v2173_v62, %v1745_v47 }
 0x59d   :  { %v1751_v46 = vsel %vm160_vm0, %v3078_v61, 0.0 }
 0x59e   :  { %1752 = vadd.xlane.f32.xlu0 %v1751_v46 }
 0x5a0   :  { %v1746_v0 = vpop.f32.mrf.mxu3 }
 0x5a1   :  { %v1747_v23 = vadd.f32 %v1746_v0, %v1719_v30 }
 0x5a3   :  { %v3082_v35 = vadd.f32 %v2174_v63, %v1747_v23 }
 0x5a5   :  { %v1754_v37 = vsel %vm160_vm0, %v3082_v35, 0.0 }
 0x5a6   :  { %1755 = vadd.xlane.f32.xlu1 %v1754_v37 }
 0x611   :  { %v1753_v36 = vpop.xlane.xlu0 %1752 }
 0x612   :  { %v1757_v2 = vmul.f32 %v1753_v36, %v2519_v10 }
 0x614   :  { %v1759_v9 = vsub.f32 %v3078_v61, %v1757_v2 }
 0x616   :  { %v1761_v38 = vmul.f32 %v1759_v9, %v1759_v9 }
 0x618   :  { %v1763_v39 = vsel %vm160_vm0, %v1761_v38, 0.0 }
 0x619   :  { %v1756_v40 = vpop.xlane.xlu1 %1755  ;;  %1764 = vadd.xlane.f32.xlu2 %v1763_v39 }
 0x61a   :  { %v1758_v41 = vmul.f32 %v1756_v40, %v2519_v10 }
 0x61c   :  { %v1760_v19 = vsub.f32 %v3082_v35, %v1758_v41 }
 0x61e   :  { %v1762_v7 = vmul.f32 %v1760_v19, %v1760_v19 }
 0x620   :  { %v1766_v17 = vsel %vm160_vm0, %v1762_v7, 0.0 }
 0x621   :  { %1767 = vadd.xlane.f32.xlu0 %v1766_v17 }
 0x68c   :  { %v1765_v34 = vpop.xlane.xlu2 %1764 }
 0x68d   :  { %v1769_v43 = vmul.f32 %v1765_v34, %v2519_v10 }
 0x68f   :  { %v1771_v49 = vadd.f32 1e-05, %v1769_v43 }
 0x691   :  { %2164 = vrsqrt.f32 %v1771_v49  ;;  %vm1779_vm14 = vweird.f32 %v1771_v49 }
 0x694   :  { %v1768_v18 = vpop.xlane.xlu0 %1767 }
 0x695   :  { %v1770_v50 = vmul.f32 %v1768_v18, %v2519_v10  ;;  %v1795_v10 = vperm.slane %v3075_v27, 6 }
 0x697   :  { %v2165_v51 = vpop.eup %2164  ;;  %v1772_v13 = vadd.f32 1e-05, %v1770_v50 }
 0x698   :  { %v1774_v26 = vmul.f32 %v2165_v51, %v1771_v49  ;;  %vm1780_vm13 = vweird.f32 %v2165_v51 }
 0x699   :  { %2166 = vrsqrt.f32 %v1772_v13  ;;  %vm1781_vm15 = vmor %vm1779_vm14, %vm1780_vm13  ;;  %vm1789_vm2 = vweird.f32 %v1772_v13 }
 0x69a   :  { %v1775_v52 = vmul.f32 %v2165_v51, %v1774_v26  ;;  %v2069_v26 = vld [vmem:[#allocation14 + $0x8] sm:$0xff] }
 0x69b   :  { %1951 = vmatpush.bf16.msrb.mxu1 %v2069_v26 }
 0x69c   :  { %v1776_v54 = vmul.f32 0.5, %v1775_v52 }
 0x69e   :  { %v1777_v21 = vsub.f32 1.5, %v1776_v54 }
 0x69f   :  { %v2167_v44 = vpop.eup %2166 }
 0x6a0   :  { %v1778_v42 = vmul.f32 %v2165_v51, %v1777_v21  ;;  %v1784_v31 = vmul.f32 %v2167_v44, %v1772_v13  ;;  %vm1790_vm1 = vweird.f32 %v2167_v44 }
 0x6a1   :  { %vm1791_vm3 = vmor %vm1789_vm2, %vm1790_vm1 }
 0x6a2   :  { %v1785_v56 = vmul.f32 %v2167_v44, %v1784_v31  ;;  %v1782_v55 = vsel %vm1781_vm15, %v2165_v51, %v1778_v42 }
 0x6a3   :  { %v1793_v8 = vmul.f32 %v1782_v55, %v1759_v9 }
 0x6a4   :  { %v1786_v60 = vmul.f32 0.5, %v1785_v56 }
 0x6a5   :  { %v1796_v32 = vmul.f32 %v1795_v10, %v1793_v8 }
 0x6a6   :  { %v1787_v25 = vsub.f32 1.5, %v1786_v60 }
 0x6a7   :  { %v1799_v53 = vadd.f32 %v1798_v29, %v1796_v32 }
 0x6a8   :  { %v1788_v1 = vmul.f32 %v2167_v44, %v1787_v25 }
 0x6aa   :  { %v1792_v28 = vsel %vm1791_vm3, %v2167_v44, %v1788_v1  ;;  %v2068_v44 = vld [vmem:[#allocation14] sm:$0xff] }
 0x6ab   :  { %v1794_v4 = vmul.f32 %v1792_v28, %v1760_v19  ;;  %1952 = vmatpush.bf16.msrb.mxu1 %v2068_v44 }
 0x6ad   :  { %v1797_v5 = vmul.f32 %v1795_v10, %v1794_v4 }
 0x6af   :  { %v1800_v6 = vadd.f32 %v1798_v29, %v1797_v5 }
 0x6b1   :  { %v1801_v11 = vpack.c.bf16 %v1800_v6, %v1799_v53 }
 0x6b3   :  { %2046 = vmatmul.msk.bf16.vlgmr.msrb.gmra.mxu0 %vm160_vm0, %v1801_v11 }
 0x730   :  { %v1831_v14 = vpop.f32.mrf.mxu0 }
 0x731   :  { %v3100_v15 = vadd.f32 %v1831_v14, %v1806_v33 }
 0x733   :  { %v3103_v16 = vmul.f32 0.70710677, %v3100_v15 }
 0x735   :  { %v1840_v48 = vmul.f32 %v3103_v16, %v3103_v16 }
 0x737   :  { %v1841_v20 = vmin.f32 %v1840_v48, 16.0 }
 0x738   :  { %v1833_v3 = vpop.f32.mrf.mxu0 }
 0x739   :  { %v1842_v22 = vmul.f32 2.1237322e-06, %v1841_v20  ;;  %v1853_v24 = vmul.f32 3.8918573e-05, %v1841_v20  ;;  %v3107_v59 = vadd.f32 %v1833_v3, %v1806_v33 }
 0x73b   :  { %v1843_v27 = vadd.f32 0.00028619796, %v1842_v22  ;;  %v1854_v30 = vadd.f32 0.001143296, %v1853_v24  ;;  %v3110_v58 = vmul.f32 0.70710677, %v3107_v59 }
 0x73d   :  { %v1855_v47 = vmul.f32 %v1854_v30, %v1841_v20  ;;  %v1880_v62 = vmul.f32 %v3110_v58, %v3110_v58  ;;  %v1844_v46 = vmul.f32 %v1843_v27, %v1841_v20 }
 0x73f   :  { %v1856_v0 = vadd.f32 0.014752088, %v1855_v47  ;;  %v1881_v23 = vmin.f32 %v1880_v62, 16.0  ;;  %v1845_v2 = vadd.f32 0.0036580483, %v1844_v46 }
 0x741   :  { %v1857_v63 = vmul.f32 %v1856_v0, %v1841_v20  ;;  %v1882_v37 = vmul.f32 2.1237322e-06, %v1881_v23  ;;  %v1893_v36 = vmul.f32 3.8918573e-05, %v1881_v23  ;;  %v1846_v7 = vmul.f32 %v1845_v2, %v1841_v20 }
 0x743   :  { %v1858_v9 = vadd.f32 0.112945676, %v1857_v63  ;;  %v1883_v38 = vadd.f32 0.00028619796, %v1882_v37  ;;  %v1894_v39 = vadd.f32 0.001143296, %v1893_v36 }
 0x744   :  { %v1847_v57 = vadd.f32 0.05243302, %v1846_v7  ;;  %v1929_v7 = vperm.slane %v3097_v12, 1 }
 0x745   :  { %v1859_v40 = vmul.f32 %v1858_v9, %v1841_v20  ;;  %v1884_v41 = vmul.f32 %v1883_v38, %v1881_v23  ;;  %v1895_v19 = vmul.f32 %v1894_v39, %v1881_v23  ;;  %v1836_v9 = vmul.f32 0.5, %v3100_v15 }
 0x746   :  { %v1848_v52 = vmul.f32 %v1847_v57, %v1841_v20  ;;  %v1837_v38 = vmul.f32 0.5, %v3107_v59 }
 0x747   :  { %v1860_v17 = vadd.f32 0.4994258, %v1859_v40  ;;  %v1885_v34 = vadd.f32 0.0036580483, %v1884_v41  ;;  %v1896_v43 = vadd.f32 0.014752088, %v1895_v19 }
 0x748   :  { %v1849_v56 = vadd.f32 0.18741608, %v1848_v52 }
 0x749   :  { %v1861_v49 = vmul.f32 %v1860_v17, %v1841_v20  ;;  %v1897_v45 = vmul.f32 %v1896_v43, %v1881_v23  ;;  %v1886_v50 = vmul.f32 %v1885_v34, %v1881_v23 }
 0x74a   :  { %v1850_v8 = vmul.f32 %v1849_v56, %v1841_v20 }
 0x74b   :  { %v1862_v18 = vadd.f32 1.0, %v1861_v49  ;;  %v1898_v51 = vadd.f32 0.112945676, %v1897_v45  ;;  %v1887_v54 = vadd.f32 0.05243302, %v1886_v50 }
 0x74c   :  { %v1851_v5 = vadd.f32 1.1283791, %v1850_v8 }
 0x74d   :  { %2168 = vrcp.f32 %v1862_v18  ;;  %v1899_v13 = vmul.f32 %v1898_v51, %v1881_v23  ;;  %v1888_v60 = vmul.f32 %v1887_v54, %v1881_v23  ;;  %v1874_v28 = vand.u32 2147483648, %v1862_v18 }
 0x74e   :  { %v1872_v32 = vand.u32 2147483647, %v1862_v18  ;;  %vm1868_vm5 = vweird.f32 %v1862_v18  ;;  %v1852_v3 = vmul.f32 %v1851_v5, %v3103_v16 }
 0x74f   :  { %v1900_v21 = vadd.f32 0.4994258, %v1899_v13  ;;  %v1889_v29 = vadd.f32 0.18741608, %v1888_v60  ;;  %v1875_v11 = vor.u32 1.1754944e-38, %v1874_v28 }
 0x750   :  { %vm1873_vm7 = vcmp.eq.f32.partialorder %v1872_v32, 8.507059e+37 }
 0x751   :  { %v1901_v42 = vmul.f32 %v1900_v21, %v1881_v23  ;;  %v1890_v33 = vmul.f32 %v1889_v29, %v1881_v23 }
 0x753   :  { %v2169_v31 = vpop.eup %2168  ;;  %v1902_v25 = vadd.f32 1.0, %v1901_v42  ;;  %v1891_v20 = vadd.f32 1.1283791, %v1890_v33 }
 0x754   :  { %v1864_v55 = vmul.f32 %v2169_v31, %v1862_v18  ;;  %vm1869_vm4 = vweird.f32 %v2169_v31 }
 0x755   :  { %2170 = vrcp.f32 %v1902_v25  ;;  %vm1870_vm6 = vmor %vm1868_vm5, %vm1869_vm4  ;;  %v1914_v24 = vand.u32 2147483648, %v1902_v25  ;;  %v1912_v47 = vand.u32 2147483647, %v1902_v25  ;;  %vm1908_vm9 = vweird.f32 %v1902_v25 }
 0x756   :  { %v1865_v10 = vsub.f32 1.0, %v1864_v55  ;;  %v1892_v63 = vmul.f32 %v1891_v20, %v3110_v58 }
 0x757   :  { %v1915_v46 = vor.u32 1.1754944e-38, %v1914_v24  ;;  %vm1913_vm11 = vcmp.eq.f32.partialorder %v1912_v47, 8.507059e+37 }
 0x758   :  { %v1866_v1 = vmul.f32 %v2169_v31, %v1865_v10 }
 0x75a   :  { %v1867_v4 = vadd.f32 %v2169_v31, %v1866_v1 }
 0x75b   :  { %v2171_v53 = vpop.eup %2170 }
 0x75c   :  { %v1871_v6 = vsel %vm1870_vm6, %v2169_v31, %v1867_v4  ;;  %v1904_v14 = vmul.f32 %v2171_v53, %v1902_v25  ;;  %vm1909_vm8 = vweird.f32 %v2171_v53 }
 0x75d   :  { %v1876_v48 = vsel %vm1873_vm7, %v1875_v11, %v1871_v6  ;;  %vm1910_vm10 = vmor %vm1908_vm9, %vm1909_vm8 }
 0x75e   :  { %v1905_v22 = vsub.f32 1.0, %v1904_v14  ;;  %v1877_v27 = vmul.f32 %v1876_v48, %v1852_v3 }
 0x760   :  { %v1906_v30 = vmul.f32 %v2171_v53, %v1905_v22  ;;  %v2047_v0 = vclamps-f32 %v1877_v27, 1.0 }
 0x762   :  { %v1907_v62 = vadd.f32 %v2171_v53, %v1906_v30  ;;  %v1920_v2 = vadd.f32 1.0, %v2047_v0 }
 0x764   :  { %v1911_v23 = vsel %vm1910_vm10, %v2171_v53, %v1907_v62  ;;  %v1922_v40 = vmul.f32 %v1920_v2, %v1836_v9 }
 0x765   :  { %v1916_v37 = vsel %vm1913_vm11, %v1915_v46, %v1911_v23 }
 0x766   :  { %v1917_v36 = vmul.f32 %v1916_v37, %v1892_v63 }
 0x768   :  { %v2048_v16 = vclamps-f32 %v1917_v36, 1.0 }
 0x76a   :  { %v1921_v39 = vadd.f32 1.0, %v2048_v16 }
 0x76c   :  { %v1923_v41 = vmul.f32 %v1921_v39, %v1837_v38 }
 0x76e   :  { %v1924_v19 = vpack.c.bf16 %v1923_v41, %v1922_v40 }
 0x770   :  { %2057 = vmatmul.msk.bf16.vlgmr.msrb.gmra.mxu1 %vm160_vm0, %v1924_v19 }
 0x7ed   :  { %v1954_v17 = vpop.f32.mrf.mxu1 }
 0x7ee   :  { %v1955_v58 = vadd.f32 %v1954_v17, %v1929_v7 }
 0x7f0   :  { %v1959_v34 = vadd.f32 %v1955_v58, %v3078_v61 }
 0x7f2   :  { %1961 = vst.msk [vmem:[#allocation16] sm:$0xff] %vm160_vm0, %v1959_v34 }
 0x7f5   :  { %v1956_v43 = vpop.f32.mrf.mxu1 }
 0x7f6   :  { %v1957_v15 = vadd.f32 %v1956_v43, %v1929_v7 }
 0x7f8   :  { %v1960_v59 = vadd.f32 %v1957_v15, %v3082_v35 }
 0x7fa   :  { %1962 = vst.msk [vmem:[#allocation16 + $0x8] sm:$0xff] %vm160_vm0, %v1960_v59 }
 0x7fb   :  { %1975 = dma.vmem_to_hbm [thread:$0]  %s1968_s5, 256, %s1970_s27, [#allocation4], %s2404_s10, %s2404_s10, %s2405_s11  }
 0x7fc   :  { %2401 = dma.done.wait [#allocation4], 256  }
 0x7fd   :  { %2402 = vsyncadd [#allocation4], 4294967040 }
 0x7fe   :  { %1980 = vsyncpa [#allocation3], 1 }
 0x7ff   :  { %1981 = vsyncpa [#allocation6], 1 }
 0x800   :  { %1982 = vsyncpa [#allocation9], 1 }
 0x801   :  { %1983 = vsyncpa [#allocation12], 1 }
 0x802   :  { %1984 = vsyncpa [#allocation15], 1 }
 0x803   :  { %1985 = vsyncpa [#allocation4], 1 }

</bundles_post_ra>
